<compile_context>
chip_gen: v6e
topology: v6e:2x2x1
jax: 0.10.0
libtpu: 0.0.40
codegen_flags: <defaults>
</compile_context>

<pallas_src>
import functools
import math

import jax
import jax.numpy as jnp
from jax import lax
from jax.experimental import pallas as pl
from jax.experimental.pallas import tpu as pltpu


# ---------------------------------------------------------------------------
# Fused Pallas kernel: one invocation per batch element.
# ---------------------------------------------------------------------------
def _fused_msa_kernel(x_ref, wqkv_ref, wproj_ref, bproj_ref, o_ref, *,
                      num_heads, head_dim, scale, l_valid):
    # x_ref:    (Lp, C)      padded tokens for one batch element
    # wqkv_ref: (C, 3*D)     [w_q | w_k | w_v] (torch weights pre-transposed)
    # wproj_ref:(D, D)
    # bproj_ref:(1, D)
    # o_ref:    (Lp, D)
    Lp = x_ref.shape[0]
    D = num_heads * head_dim

    x = x_ref[...]
    # Single fused QKV projection on the MXU (f32 accumulation), bias-free.
    qkv = jnp.dot(x, wqkv_ref[...], preferred_element_type=jnp.float32)  # (Lp, 3D)

    # Mask for padded key columns (padded query rows are zeros from the padded
    # input and get sliced away in the wrapper, so they need no masking).
    col = lax.broadcasted_iota(jnp.int32, (Lp, Lp), 1)
    key_mask = col < l_valid

    ctx_parts = []
    for h in range(num_heads):                       # static unrolled loop, 4 heads
        lo = h * head_dim
        q_h = qkv[:, lo:lo + head_dim]               # (Lp, hd)
        k_h = qkv[:, D + lo:D + lo + head_dim]       # (Lp, hd)
        v_h = qkv[:, 2 * D + lo:2 * D + lo + head_dim]

        # scores = q @ k^T * scale   (contract on head_dim)
        s = lax.dot_general(q_h, k_h, (((1,), (1,)), ((), ())),
                            preferred_element_type=jnp.float32) * scale
        s = jnp.where(key_mask, s, jnp.float32(-1e30))
        m = jnp.max(s, axis=-1, keepdims=True)
        p = jnp.exp(s - m)
        inv = pl.reciprocal(jnp.sum(p, axis=-1, keepdims=True), approx=True)
        ctx_parts.append(jnp.dot(p, v_h, preferred_element_type=jnp.float32) * inv)

    # Lane-dense (Lp, D) context slab -> output projection, single store.
    ctx = jnp.concatenate(ctx_parts, axis=-1)
    out = jnp.dot(ctx, wproj_ref[...], preferred_element_type=jnp.float32)
    out = out + bproj_ref[...]
    o_ref[...] = out.astype(o_ref.dtype)


def fused_multiscale_attention(x_pad, w_qkv, w_proj, b_proj, *,
                               num_heads, head_dim, scale, l_valid):
    """x_pad: (B, Lp, C); returns (B, Lp, D) with D = num_heads*head_dim."""
    B, Lp, C = x_pad.shape
    D = num_heads * head_dim
    kernel = functools.partial(
        _fused_msa_kernel, num_heads=num_heads, head_dim=head_dim,
        scale=scale, l_valid=l_valid)
    return pl.pallas_call(
        kernel,
        out_shape=jax.ShapeDtypeStruct((B, Lp, D), x_pad.dtype),
        grid=(B,),
        in_specs=[
            pl.BlockSpec((None, Lp, C), lambda b: (b, 0, 0)),
            pl.BlockSpec((C, 3 * D), lambda b: (0, 0)),
            pl.BlockSpec((D, D), lambda b: (0, 0)),
            pl.BlockSpec((1, D), lambda b: (0, 0)),
        ],
        out_specs=pl.BlockSpec((None, Lp, D), lambda b: (b, 0, 0)),
        compiler_params=pltpu.CompilerParams(
            dimension_semantics=("parallel",)),
    )(x_pad, w_qkv, w_proj, b_proj)


# ---------------------------------------------------------------------------
# Module wrapper (parameter setup, padding/reshape glue; hot path in Pallas)
# ---------------------------------------------------------------------------
class MultiScaleAttentionPallas:
    def __init__(self, dim, dim_out, input_size, num_heads=8, qkv_bias=False,
                 qk_scale=None, kernel_q=(1, 1), kernel_kv=(1, 1),
                 stride_q=(1, 1), stride_kv=(1, 1), has_cls_embed=True,
                 pool_first=True, keys=None):
        assert kernel_q == (1, 1) and kernel_kv == (1, 1), \
            "only the Identity-pooling configuration is exercised here"
        # TODO(synk): depthwise-conv / avg pooling branch (kernel > 1) not implemented
        # as a Pallas kernel; with the default (1,1) kernels PyTorch uses nn.Identity.
        assert not qkv_bias, "qkv_bias=False path (module default)"
        self.dim_in = dim
        self.dim_out = dim_out
        self.num_heads = num_heads
        self.head_dim = dim_out // num_heads
        self.scale = qk_scale or self.head_dim ** (-0.5)
        self.has_cls_embed = has_cls_embed
        self.pool_first = pool_first
        self.input_size = input_size
        self.kernel_q, self.kernel_kv = kernel_q, kernel_kv
        self.stride_q, self.stride_kv = stride_q, stride_kv

        kq, kk, kv, kp, kb = keys

        def init(k, shape, fan_in):
            # torch nn.Linear default: U(-1/sqrt(fan_in), 1/sqrt(fan_in))
            bound = 1.0 / math.sqrt(fan_in)
            return jax.random.uniform(k, shape, jnp.float32, -bound, bound)

        # torch Linear weight is (out, in); stored transposed (in, out) for x @ W.
        self.w_q = init(kq, (dim, dim_out), dim)
        self.w_k = init(kk, (dim, dim_out), dim)
        self.w_v = init(kv, (dim, dim_out), dim)
        self.w_proj = init(kp, (dim_out, dim_out), dim_out)
        self.b_proj = init(kb, (dim_out,), dim_out)

        # Fused QKV weight for a single projection matmul inside the kernel.
        self.w_qkv = jnp.concatenate([self.w_q, self.w_k, self.w_v], axis=1)
        self.b_proj2d = self.b_proj.reshape(1, dim_out)

    def __call__(self, x, hw_shape):
        B, N, C = x.shape
        H, W = hw_shape
        assert C == self.dim_in

        if self.has_cls_embed:
            # pool_first path with (1,1) kernels: split cls, NCHW round-trip through
            # nn.Identity pooling, re-concat -> mathematically a no-op on x.
            x_qkv = x
        else:
            x_qkv = x
        L = x_qkv.shape[1]

        # Pad token axis to a sublane multiple of 8 for clean (8,128)-aligned tiles.
        Lp = ((L + 7) // 8) * 8
        x_pad = jnp.pad(x_qkv, ((0, 0), (0, Lp - L), (0, 0)))

        out_pad = fused_multiscale_attention(
            x_pad, self.w_qkv, self.w_proj, self.b_proj2d,
            num_heads=self.num_heads, head_dim=self.head_dim,
            scale=self.scale, l_valid=L)
        out = out_pad[:, :L, :]

        q_hw = ((H + 2 * (self.kernel_q[0] // 2) - self.kernel_q[0]) // self.stride_q[0] + 1,
                (W + 2 * (self.kernel_q[1] // 2) - self.kernel_q[1]) // self.stride_q[1] + 1)
        return out, q_hw

    # Pure-JAX reference of the same forward (for correctness check).
    def reference(self, x, hw_shape):
        B, N, C = x.shape
        H, W = hw_shape
        nH, hd = self.num_heads, self.head_dim
        q = (x @ self.w_q).reshape(B, N, nH, hd).transpose(0, 2, 1, 3)
        k = (x @ self.w_k).reshape(B, N, nH, hd).transpose(0, 2, 1, 3)
        v = (x @ self.w_v).reshape(B, N, nH, hd).transpose(0, 2, 1, 3)
        s = jnp.einsum('bhqd,bhkd->bhqk', q, k) * self.scale
        p = jax.nn.softmax(s, axis=-1)
        ctx = jnp.einsum('bhqk,bhkd->bhqd', p, v)
        out = ctx.transpose(0, 2, 1, 3).reshape(B, N, self.dim_out)
        out = out @ self.w_proj + self.b_proj
        return out, (H, W)


if __name__ == "__main__":
    B = 2
    dim = 32
    dim_out = 32
    num_heads = 4
    H = W = 8
    N = 1 + H * W                       # cls token + H*W spatial tokens

    key = jax.random.PRNGKey(0)
    kx, kq, kk, kv, kp, kb = jax.random.split(key, 6)
    x = jax.random.normal(kx, (B, N, dim), dtype=jnp.float32)

    module = MultiScaleAttentionPallas(
        dim=dim, dim_out=dim_out, input_size=(H, W), num_heads=num_heads,
        qkv_bias=False, has_cls_embed=True, pool_first=True,
        keys=(kq, kk, kv, kp, kb))

    out, out_hw = module(x, (H, W))
    out = jax.block_until_ready(out)

    ref, _ = module.reference(x, (H, W))
    assert out.shape == (B, N, dim_out), out.shape
    assert tuple(out_hw) == (H, W), out_hw
    assert bool(jnp.all(jnp.isfinite(out)))
    assert bool(jnp.allclose(out, ref, atol=2e-2, rtol=2e-2)), \
        float(jnp.max(jnp.abs(out - ref)))

    print("KERNEL_OK")
</pallas_src>

<mosaic_0001>
module attributes {stable_mosaic.version = 11 : i64} {
  func.func @_fused_msa_kernel(%arg0: i32, %arg1: memref<1x72x32xf32, #tpu.memory_space<vmem>>, %arg2: memref<32x96xf32, #tpu.memory_space<vmem>>, %arg3: memref<32x32xf32, #tpu.memory_space<vmem>>, %arg4: memref<1x32xf32, #tpu.memory_space<vmem>>, %arg5: memref<1x72x32xf32, #tpu.memory_space<vmem>>) attributes {dimension_semantics = [#tpu.dimension_semantics<parallel>], iteration_bounds = array<i64: 2>, scalar_prefetch = 0 : i64, scratch_operands = 0 : i64, tpu.core_type = #tpu.core_type<tc>, window_params = [{transform_indices = @transform_0, window_bounds = array<i64: 1, 72, 32>}, {pipeline_mode = #tpu.pipeline_mode<synchronous>, transform_indices = @transform_1, window_bounds = array<i64: 32, 96>}, {pipeline_mode = #tpu.pipeline_mode<synchronous>, transform_indices = @transform_2, window_bounds = array<i64: 32, 32>}, {pipeline_mode = #tpu.pipeline_mode<synchronous>, transform_indices = @transform_3, window_bounds = array<i64: 1, 32>}, {transform_indices = @transform_4, window_bounds = array<i64: 1, 72, 32>}]} {
    %c0 = arith.constant 0 : index
    %c0_0 = arith.constant 0 : index
    %c0_1 = arith.constant 0 : index
    %0 = vector.load %arg1[%c0, %c0_0, %c0_1] : memref<1x72x32xf32, #tpu.memory_space<vmem>>, vector<1x72x32xf32>
    %1 = vector.shape_cast %0 : vector<1x72x32xf32> to vector<72x32xf32>
    %c0_2 = arith.constant 0 : index
    %c0_3 = arith.constant 0 : index
    %2 = vector.load %arg2[%c0_2, %c0_3] : memref<32x96xf32, #tpu.memory_space<vmem>>, vector<32x96xf32>
    %cst = arith.constant dense<0.000000e+00> : vector<72x96xf32>
    %3 = tpu.matmul %1, %2, %cst {dimension_numbers = #tpu.dot_dimension_numbers<[1], [0], [0], [1], [0, 0, 1, 1], [], []>} : vector<72x32xf32>, vector<32x96xf32>, vector<72x96xf32> -> vector<72x96xf32>
    %4 = tpu.iota {dimensions = array<i32: 1>} : vector<72x72xi32>
    %c65_i32 = arith.constant 65 : i32
    %5 = vector.broadcast %c65_i32 : i32 to vector<72x72xi32>
    %6 = arith.cmpi slt, %4, %5 : vector<72x72xi32>
    %7 = vector.extract_strided_slice %3 {offsets = [0, 0], sizes = [72, 8], strides = [1, 1]} : vector<72x96xf32> to vector<72x8xf32>
    %8 = vector.extract_strided_slice %3 {offsets = [0, 32], sizes = [72, 8], strides = [1, 1]} : vector<72x96xf32> to vector<72x8xf32>
    %9 = vector.extract_strided_slice %3 {offsets = [0, 64], sizes = [72, 8], strides = [1, 1]} : vector<72x96xf32> to vector<72x8xf32>
    %cst_4 = arith.constant dense<0.000000e+00> : vector<72x72xf32>
    %10 = tpu.matmul %7, %8, %cst_4 {dimension_numbers = #tpu.dot_dimension_numbers<[1], [1], [0], [0], [0, 0, 1, 0], [], []>} : vector<72x8xf32>, vector<72x8xf32>, vector<72x72xf32> -> vector<72x72xf32>
    %cst_5 = arith.constant 0.353553385 : f32
    %11 = vector.broadcast %cst_5 : f32 to vector<72x72xf32>
    %12 = arith.mulf %10, %11 : vector<72x72xf32>
    %cst_6 = arith.constant -1.000000e+30 : f32
    %13 = vector.broadcast %cst_6 : f32 to vector<72x72xf32>
    %14 = arith.select %6, %12, %13 : vector<72x72xi1>, vector<72x72xf32>
    %cst_7 = arith.constant dense<0xFF800000> : vector<72xf32>
    %15 = vector.multi_reduction <maximumf>, %14, %cst_7 [1] : vector<72x72xf32> to vector<72xf32>
    %16 = vector.shape_cast %15 : vector<72xf32> to vector<72x1xf32>
    %17 = vector.broadcast %16 : vector<72x1xf32> to vector<72x72xf32>
    %18 = arith.subf %14, %17 : vector<72x72xf32>
    %19 = math.exp %18 : vector<72x72xf32>
    %cst_8 = arith.constant dense<0.000000e+00> : vector<72xf32>
    %20 = vector.multi_reduction <add>, %19, %cst_8 [1] : vector<72x72xf32> to vector<72xf32>
    %21 = vector.shape_cast %20 : vector<72xf32> to vector<72x1xf32>
    %22 = tpu.reciprocal %21 {approx = true} : vector<72x1xf32> -> vector<72x1xf32>
    %cst_9 = arith.constant dense<0.000000e+00> : vector<72x8xf32>
    %23 = tpu.matmul %19, %9, %cst_9 {dimension_numbers = #tpu.dot_dimension_numbers<[1], [0], [0], [1], [0, 0, 1, 1], [], []>} : vector<72x72xf32>, vector<72x8xf32>, vector<72x8xf32> -> vector<72x8xf32>
    %24 = vector.broadcast %22 : vector<72x1xf32> to vector<72x8xf32>
    %25 = arith.mulf %23, %24 : vector<72x8xf32>
    %26 = vector.extract_strided_slice %3 {offsets = [0, 8], sizes = [72, 8], strides = [1, 1]} : vector<72x96xf32> to vector<72x8xf32>
    %27 = vector.extract_strided_slice %3 {offsets = [0, 40], sizes = [72, 8], strides = [1, 1]} : vector<72x96xf32> to vector<72x8xf32>
    %28 = vector.extract_strided_slice %3 {offsets = [0, 72], sizes = [72, 8], strides = [1, 1]} : vector<72x96xf32> to vector<72x8xf32>
    %cst_10 = arith.constant dense<0.000000e+00> : vector<72x72xf32>
    %29 = tpu.matmul %26, %27, %cst_10 {dimension_numbers = #tpu.dot_dimension_numbers<[1], [1], [0], [0], [0, 0, 1, 0], [], []>} : vector<72x8xf32>, vector<72x8xf32>, vector<72x72xf32> -> vector<72x72xf32>
    %cst_11 = arith.constant 0.353553385 : f32
    %30 = vector.broadcast %cst_11 : f32 to vector<72x72xf32>
    %31 = arith.mulf %29, %30 : vector<72x72xf32>
    %cst_12 = arith.constant -1.000000e+30 : f32
    %32 = vector.broadcast %cst_12 : f32 to vector<72x72xf32>
    %33 = arith.select %6, %31, %32 : vector<72x72xi1>, vector<72x72xf32>
    %cst_13 = arith.constant dense<0xFF800000> : vector<72xf32>
    %34 = vector.multi_reduction <maximumf>, %33, %cst_13 [1] : vector<72x72xf32> to vector<72xf32>
    %35 = vector.shape_cast %34 : vector<72xf32> to vector<72x1xf32>
    %36 = vector.broadcast %35 : vector<72x1xf32> to vector<72x72xf32>
    %37 = arith.subf %33, %36 : vector<72x72xf32>
    %38 = math.exp %37 : vector<72x72xf32>
    %cst_14 = arith.constant dense<0.000000e+00> : vector<72xf32>
    %39 = vector.multi_reduction <add>, %38, %cst_14 [1] : vector<72x72xf32> to vector<72xf32>
    %40 = vector.shape_cast %39 : vector<72xf32> to vector<72x1xf32>
    %41 = tpu.reciprocal %40 {approx = true} : vector<72x1xf32> -> vector<72x1xf32>
    %cst_15 = arith.constant dense<0.000000e+00> : vector<72x8xf32>
    %42 = tpu.matmul %38, %28, %cst_15 {dimension_numbers = #tpu.dot_dimension_numbers<[1], [0], [0], [1], [0, 0, 1, 1], [], []>} : vector<72x72xf32>, vector<72x8xf32>, vector<72x8xf32> -> vector<72x8xf32>
    %43 = vector.broadcast %41 : vector<72x1xf32> to vector<72x8xf32>
    %44 = arith.mulf %42, %43 : vector<72x8xf32>
    %45 = vector.extract_strided_slice %3 {offsets = [0, 16], sizes = [72, 8], strides = [1, 1]} : vector<72x96xf32> to vector<72x8xf32>
    %46 = vector.extract_strided_slice %3 {offsets = [0, 48], sizes = [72, 8], strides = [1, 1]} : vector<72x96xf32> to vector<72x8xf32>
    %47 = vector.extract_strided_slice %3 {offsets = [0, 80], sizes = [72, 8], strides = [1, 1]} : vector<72x96xf32> to vector<72x8xf32>
    %cst_16 = arith.constant dense<0.000000e+00> : vector<72x72xf32>
    %48 = tpu.matmul %45, %46, %cst_16 {dimension_numbers = #tpu.dot_dimension_numbers<[1], [1], [0], [0], [0, 0, 1, 0], [], []>} : vector<72x8xf32>, vector<72x8xf32>, vector<72x72xf32> -> vector<72x72xf32>
    %cst_17 = arith.constant 0.353553385 : f32
    %49 = vector.broadcast %cst_17 : f32 to vector<72x72xf32>
    %50 = arith.mulf %48, %49 : vector<72x72xf32>
    %cst_18 = arith.constant -1.000000e+30 : f32
    %51 = vector.broadcast %cst_18 : f32 to vector<72x72xf32>
    %52 = arith.select %6, %50, %51 : vector<72x72xi1>, vector<72x72xf32>
    %cst_19 = arith.constant dense<0xFF800000> : vector<72xf32>
    %53 = vector.multi_reduction <maximumf>, %52, %cst_19 [1] : vector<72x72xf32> to vector<72xf32>
    %54 = vector.shape_cast %53 : vector<72xf32> to vector<72x1xf32>
    %55 = vector.broadcast %54 : vector<72x1xf32> to vector<72x72xf32>
    %56 = arith.subf %52, %55 : vector<72x72xf32>
    %57 = math.exp %56 : vector<72x72xf32>
    %cst_20 = arith.constant dense<0.000000e+00> : vector<72xf32>
    %58 = vector.multi_reduction <add>, %57, %cst_20 [1] : vector<72x72xf32> to vector<72xf32>
    %59 = vector.shape_cast %58 : vector<72xf32> to vector<72x1xf32>
    %60 = tpu.reciprocal %59 {approx = true} : vector<72x1xf32> -> vector<72x1xf32>
    %cst_21 = arith.constant dense<0.000000e+00> : vector<72x8xf32>
    %61 = tpu.matmul %57, %47, %cst_21 {dimension_numbers = #tpu.dot_dimension_numbers<[1], [0], [0], [1], [0, 0, 1, 1], [], []>} : vector<72x72xf32>, vector<72x8xf32>, vector<72x8xf32> -> vector<72x8xf32>
    %62 = vector.broadcast %60 : vector<72x1xf32> to vector<72x8xf32>
    %63 = arith.mulf %61, %62 : vector<72x8xf32>
    %64 = vector.extract_strided_slice %3 {offsets = [0, 24], sizes = [72, 8], strides = [1, 1]} : vector<72x96xf32> to vector<72x8xf32>
    %65 = vector.extract_strided_slice %3 {offsets = [0, 56], sizes = [72, 8], strides = [1, 1]} : vector<72x96xf32> to vector<72x8xf32>
    %66 = vector.extract_strided_slice %3 {offsets = [0, 88], sizes = [72, 8], strides = [1, 1]} : vector<72x96xf32> to vector<72x8xf32>
    %cst_22 = arith.constant dense<0.000000e+00> : vector<72x72xf32>
    %67 = tpu.matmul %64, %65, %cst_22 {dimension_numbers = #tpu.dot_dimension_numbers<[1], [1], [0], [0], [0, 0, 1, 0], [], []>} : vector<72x8xf32>, vector<72x8xf32>, vector<72x72xf32> -> vector<72x72xf32>
    %cst_23 = arith.constant 0.353553385 : f32
    %68 = vector.broadcast %cst_23 : f32 to vector<72x72xf32>
    %69 = arith.mulf %67, %68 : vector<72x72xf32>
    %cst_24 = arith.constant -1.000000e+30 : f32
    %70 = vector.broadcast %cst_24 : f32 to vector<72x72xf32>
    %71 = arith.select %6, %69, %70 : vector<72x72xi1>, vector<72x72xf32>
    %cst_25 = arith.constant dense<0xFF800000> : vector<72xf32>
    %72 = vector.multi_reduction <maximumf>, %71, %cst_25 [1] : vector<72x72xf32> to vector<72xf32>
    %73 = vector.shape_cast %72 : vector<72xf32> to vector<72x1xf32>
    %74 = vector.broadcast %73 : vector<72x1xf32> to vector<72x72xf32>
    %75 = arith.subf %71, %74 : vector<72x72xf32>
    %76 = math.exp %75 : vector<72x72xf32>
    %cst_26 = arith.constant dense<0.000000e+00> : vector<72xf32>
    %77 = vector.multi_reduction <add>, %76, %cst_26 [1] : vector<72x72xf32> to vector<72xf32>
    %78 = vector.shape_cast %77 : vector<72xf32> to vector<72x1xf32>
    %79 = tpu.reciprocal %78 {approx = true} : vector<72x1xf32> -> vector<72x1xf32>
    %cst_27 = arith.constant dense<0.000000e+00> : vector<72x8xf32>
    %80 = tpu.matmul %76, %66, %cst_27 {dimension_numbers = #tpu.dot_dimension_numbers<[1], [0], [0], [1], [0, 0, 1, 1], [], []>} : vector<72x72xf32>, vector<72x8xf32>, vector<72x8xf32> -> vector<72x8xf32>
    %81 = vector.broadcast %79 : vector<72x1xf32> to vector<72x8xf32>
    %82 = arith.mulf %80, %81 : vector<72x8xf32>
    %83 = tpu.concatenate %25, %44, %63, %82 in 1 : vector<72x8xf32>, vector<72x8xf32>, vector<72x8xf32>, vector<72x8xf32> -> vector<72x32xf32>
    %c0_28 = arith.constant 0 : index
    %c0_29 = arith.constant 0 : index
    %84 = vector.load %arg3[%c0_28, %c0_29] : memref<32x32xf32, #tpu.memory_space<vmem>>, vector<32x32xf32>
    %cst_30 = arith.constant dense<0.000000e+00> : vector<72x32xf32>
    %85 = tpu.matmul %83, %84, %cst_30 {dimension_numbers = #tpu.dot_dimension_numbers<[1], [0], [0], [1], [0, 0, 1, 1], [], []>} : vector<72x32xf32>, vector<32x32xf32>, vector<72x32xf32> -> vector<72x32xf32>
    %c0_31 = arith.constant 0 : index
    %c0_32 = arith.constant 0 : index
    %86 = vector.load %arg4[%c0_31, %c0_32] : memref<1x32xf32, #tpu.memory_space<vmem>>, vector<1x32xf32>
    %87 = vector.broadcast %86 : vector<1x32xf32> to vector<72x32xf32>
    %88 = arith.addf %85, %87 : vector<72x32xf32>
    %c0_33 = arith.constant 0 : index
    %c0_34 = arith.constant 0 : index
    %c0_35 = arith.constant 0 : index
    %89 = vector.load %arg5[%c0_33, %c0_34, %c0_35] : memref<1x72x32xf32, #tpu.memory_space<vmem>>, vector<1x72x32xf32>
    %90 = vector.shape_cast %89 : vector<1x72x32xf32> to vector<72x32xf32>
    %91 = vector.shape_cast %88 : vector<72x32xf32> to vector<1x72x32xf32>
    tpu.vector_store %arg5[%c0_33, %c0_34, %c0_35], %91 {strides = array<i32>} : memref<1x72x32xf32, #tpu.memory_space<vmem>>, vector<1x72x32xf32>,
    return
  }
  func.func @transform_0(%arg0: i32) -> (i32, i32, i32) {
    %c0_i32 = arith.constant 0 : i32
    %c0_i32_0 = arith.constant 0 : i32
    %c0_i32_1 = arith.constant 0 : i32
    return %arg0, %c0_i32, %c0_i32_0 : i32, i32, i32
  }
  func.func @transform_1(%arg0: i32) -> (i32, i32) {
    %c0_i32 = arith.constant 0 : i32
    %c0_i32_0 = arith.constant 0 : i32
    %c0_i32_1 = arith.constant 0 : i32
    return %c0_i32, %c0_i32_0 : i32, i32
  }
  func.func @transform_2(%arg0: i32) -> (i32, i32) {
    %c0_i32 = arith.constant 0 : i32
    %c0_i32_0 = arith.constant 0 : i32
    %c0_i32_1 = arith.constant 0 : i32
    return %c0_i32, %c0_i32_0 : i32, i32
  }
  func.func @transform_3(%arg0: i32) -> (i32, i32) {
    %c0_i32 = arith.constant 0 : i32
    %c0_i32_0 = arith.constant 0 : i32
    %c0_i32_1 = arith.constant 0 : i32
    return %c0_i32, %c0_i32_0 : i32, i32
  }
  func.func @transform_4(%arg0: i32) -> (i32, i32, i32) {
    %c0_i32 = arith.constant 0 : i32
    %c0_i32_0 = arith.constant 0 : i32
    %c0_i32_1 = arith.constant 0 : i32
    return %arg0, %c0_i32, %c0_i32_0 : i32, i32, i32
  }
}

</mosaic_0001>

<bundles_post_ra>
// kernel: tpu_custom_call.1
= control target key start
LH: loop header
LB: loop body
LE: loop exit
PB: predicated region body
PF: predicated region fallthrough
CT: control target
= control target key end

     0   :  { %s3508_s15 = smov 0   ;;  %s4720_s0 = inlined_call_operand.vmem [shape: f32[2,72,32], index: 0, kind: input, shape index: {}]   ;;  %s4721_s1 = inlined_call_operand.vmem [shape: f32[32,96], index: 1, kind: input, shape index: {}]   ;;  %s4722_s2 = inlined_call_operand.vmem [shape: f32[32,32], index: 2, kind: input, shape index: {}]   ;;  %s4723_s3 = inlined_call_operand.vmem [shape: f32[1,32], index: 3, kind: input, shape index: {}]   ;;  %s4724_s4 = inlined_call_operand.vmem [shape: f32[2,72,32], index: 4, kind: output, shape index: {}]  }
   0x1 LB: > { %s2546_s16 = sadd.s32 4294967295, %s3465_s15   ;;  %p2550_p0 = scmp.ge.s32.totalorder %s3465_s15, 1  ;;  %s3465_s15 = sphi %s3508_s15, %s14_s15  }
   0x2   : > { %p162_p1 = scmp.lt.s32.totalorder %s3465_s15, 3 }
   0x4   : > { %p163_p2 = pnand %p2550_p0, %p162_p1 }
   0x6   : > { %166 = sbr.rel (%p163_p2) target bundleno = 1445 (0x5a5), region = 36 }
   0xb   : > { %v210_v0 = vld [vmem:[%s4721_s1 + $0x18] sm:$0xff]  ;;  %p188_p3 = scmp.lt.s32.totalorder %s2546_s16, 1  ;;  %v4725_v1 = vmov 0.0   ;;  %v209_v2 = vld [vmem:[%s4721_s1 + $0x10] sm:$0xff]  ;;  %vm3468_vm0 = vmmov 0   ;;  %v208_v3 = vld [vmem:[%s4721_s1 + $0x8] sm:$0xff] }
   0xc   : > { %2852 = vmatprep.subr.mxu0 %v4725_v1  ;;  %2860 = vmatprep.mubr.msk.f32.mxu0 %vm3468_vm0, %v4725_v1  ;;  %v207_v4 = vld [vmem:[%s4721_s1] sm:$0xff]  ;;  %vm211_vm1 = vcmask 261120   ;;  %s3469_s29 = smov 96   ;;  %s3470_s30 = smov 88   ;;  %vm379_vm2 = vcmask 64512   ;;  %vm544_vm4 = vcmask 588800  }
   0xd   : > { %2853 = vmatpush3.msra.mxu0 %v210_v0  ;;  %s4755_s16 = smov (!%p188_p3, %s2546_s16), 1  ;;  %2887 = vmatprep.subr.mxu1 %v4725_v1  ;;  %s3471_s5 = smov 80   ;;  %vm2314_vm5 = vcmask 130048   ;;  %vm2324_vm6 = vcmask 195584  }
   0xe   : > { %2854 = vmatprep.subr.mxu0 %v4725_v1  ;;  %2905 = vmatprep.mubr.msk.f32.mxu1 %vm3468_vm0, %v4725_v1  ;;  %s3290_s23 = smul.u32 72, %s4755_s16  ;;  %s3472_s6 = smov 120  }
   0xf   : > { %2855 = vmatpush3.msra.mxu0 %v209_v2  ;;  %s3473_s7 = smov 72   ;;  %s3474_s8 = smov 112  }
  0x10   : > { %2856 = vmatprep.subr.mxu0 %v4725_v1  ;;  %s192_s28 = scalar_lea.vmem %s4720_s0, %s3290_s23  ;;  %s3475_s9 = smov 104  }
  0x11   : > { %2857 = vmatpush3.msra.mxu0 %v208_v3  ;;  %v198_v5 = vld [vmem:[%s192_s28] sm:$0xff]  ;;  %v199_v6 = vld [vmem:[%s192_s28 + $0x8] sm:$0xff]  ;;  %v200_v7 = vld [vmem:[%s192_s28 + $0x10] sm:$0xff]  ;;  %s3476_s10 = smov 64   ;;  %s3477_s11 = smov 56  }
  0x12   : > { %2858 = vmatprep.subr.mxu0 %v4725_v1  ;;  %v201_v8 = vld [vmem:[%s192_s28 + $0x18] sm:$0xff]  ;;  %v202_v9 = vld [vmem:[%s192_s28 + $0x20] sm:$0xff]  ;;  %v203_v10 = vld [vmem:[%s192_s28 + $0x28] sm:$0xff]  ;;  %s3478_s12 = smov 48   ;;  %s3479_s13 = smov 40  }
  0x13   : > { %2859 = vmatpush3.msra.mxu0 %v207_v4  ;;  %v204_v11 = vld [vmem:[%s192_s28 + $0x30] sm:$0xff]  ;;  %v205_v12 = vld [vmem:[%s192_s28 + $0x38] sm:$0xff]  ;;  %v206_v13 = vld [vmem:[%s192_s28 + $0x40] sm:$0xff]  ;;  %s3480_s14 = smov 8   ;;  %s3481_s17 = smov 16  }
  0x14   : > { %2861 = vmatmul.mubr.msk.f32.vlgmr.msra.gmra.mxu0 %vm211_vm1, %v198_v5  ;;  %2932 = vmatprep.subr.mxu0 %v4725_v1  ;;  %s3482_s27 = smov 24  }
  0x15   : > { %2863 = vmatprep.mubr.msk.f32.mxu0 %vm3468_vm0, %v4725_v1 }
  0x18   : > { %2864 = vmatmul.mubr.msk.f32.gmra.mxu0 %vm211_vm1, %v199_v6 }
  0x19   : > { %2866 = vmatprep.mubr.msk.f32.mxu0 %vm3468_vm0, %v4725_v1 }
  0x1c   : > { %2867 = vmatmul.mubr.msk.f32.gmra.mxu0 %vm211_vm1, %v200_v7 }
  0x1d   : > { %2869 = vmatprep.mubr.msk.f32.mxu0 %vm3468_vm0, %v4725_v1 }
  0x20   : > { %2870 = vmatmul.mubr.msk.f32.gmra.mxu0 %vm211_vm1, %v201_v8 }
  0x21   : > { %2872 = vmatprep.mubr.msk.f32.mxu0 %vm3468_vm0, %v4725_v1 }
  0x24   : > { %2873 = vmatmul.mubr.msk.f32.gmra.mxu0 %vm211_vm1, %v202_v9 }
  0x25   : > { %2875 = vmatprep.mubr.msk.f32.mxu0 %vm3468_vm0, %v4725_v1 }
  0x28   : > { %2876 = vmatmul.mubr.msk.f32.gmra.mxu0 %vm211_vm1, %v203_v10 }
  0x29   : > { %2878 = vmatprep.mubr.msk.f32.mxu0 %vm3468_vm0, %v4725_v1 }
  0x2c   : > { %2879 = vmatmul.mubr.msk.f32.gmra.mxu0 %vm211_vm1, %v204_v11 }
  0x2d   : > { %2881 = vmatprep.mubr.msk.f32.mxu0 %vm3468_vm0, %v4725_v1 }
  0x30   : > { %2882 = vmatmul.mubr.msk.f32.gmra.mxu0 %vm211_vm1, %v205_v12 }
  0x31   : > { %2884 = vmatprep.mubr.msk.f32.mxu0 %vm3468_vm0, %v4725_v1 }
  0x34   : > { %2885 = vmatmul.mubr.msk.f32.gmra.mxu0 %vm211_vm1, %v206_v13 }
  0x35   : > { %2950 = vmatprep.mubr.msk.f32.mxu0 %vm3468_vm0, %v4725_v1 }
  0xd4   : > { %v3573_v14 = vpop.f32.mrf.mxu0 }
  0xd6   : > { %v2862_v15 = vpop.f32.mrf.mxu0 }
  0xd8   : > { %v3575_v16 = vpop.f32.mrf.mxu0 }
  0xda   : > { %v2865_v17 = vpop.f32.mrf.mxu0 }
  0xdc   : > { %v3577_v18 = vpop.f32.mrf.mxu0 }
  0xde   : > { %v2868_v19 = vpop.f32.mrf.mxu0 }
  0xe0   : > { %v3579_v20 = vpop.f32.mrf.mxu0 }
  0xe2   : > { %v2871_v21 = vpop.f32.mrf.mxu0 }
  0xe4   : > { %v3581_v22 = vpop.f32.mrf.mxu0 }
  0xe6   : > { %v2874_v23 = vpop.f32.mrf.mxu0 }
  0xe8   : > { %v3583_v24 = vpop.f32.mrf.mxu0 }
  0xea   : > { %v2877_v25 = vpop.f32.mrf.mxu0 }
  0xec   : > { %v3585_v26 = vpop.f32.mrf.mxu0 }
  0xed   : > { %373 = vrot.lane.b32.xlu1 %v3585_v26, %s3469_s29 }
  0xee   : > { %v2880_v27 = vpop.f32.mrf.mxu0 }
  0xf0   : > { %v3588_v28 = vpop.f32.mrf.mxu0 }
  0xf1   : > { %371 = vrot.lane.b32.xlu1 %v3583_v24, %s3469_s29 }
  0xf2   : > { %v2883_v29 = vpop.f32.mrf.mxu0 }
  0xf4   : > { %v3591_v30 = vpop.f32.mrf.mxu0 }
  0xf5   : > { %367 = vrot.lane.b32.xlu1 %v3579_v20, %s3469_s29  ;;  %377 = vrot.lane.b32.xlu0 %v3591_v30, %s3469_s29 }
  0xf6   : > { %v2886_v31 = vpop.f32.mrf.mxu0 }
  0xf9   : > { %363 = vrot.lane.b32.xlu1 %v3575_v16, %s3469_s29  ;;  %375 = vrot.lane.b32.xlu0 %v3588_v28, %s3469_s29 }
  0xfd   : > { %842 = vrot.lane.b32.xlu1 %v3591_v30, %s3470_s30  ;;  %369 = vrot.lane.b32.xlu0 %v3581_v22, %s3469_s29 }
 0x101   : > { %838 = vrot.lane.b32.xlu1 %v3585_v26, %s3470_s30  ;;  %365 = vrot.lane.b32.xlu0 %v3577_v18, %s3469_s29 }
 0x105   : > { %834 = vrot.lane.b32.xlu1 %v3581_v22, %s3470_s30  ;;  %361 = vrot.lane.b32.xlu0 %v3573_v14, %s3469_s29 }
 0x109   : > { %830 = vrot.lane.b32.xlu1 %v3577_v18, %s3470_s30  ;;  %840 = vrot.lane.b32.xlu0 %v3588_v28, %s3470_s30 }
 0x10d   : > { %826 = vrot.lane.b32.xlu1 %v3573_v14, %s3470_s30  ;;  %836 = vrot.lane.b32.xlu0 %v3583_v24, %s3470_s30 }
 0x111   : > { %1305 = vrot.lane.b32.xlu1 %v3591_v30, %s3471_s5  ;;  %832 = vrot.lane.b32.xlu0 %v3579_v20, %s3470_s30 }
 0x115   : > { %1303 = vrot.lane.b32.xlu1 %v3588_v28, %s3471_s5  ;;  %828 = vrot.lane.b32.xlu0 %v3575_v16, %s3470_s30 }
 0x119   : > { %1301 = vrot.lane.b32.xlu1 %v3585_v26, %s3471_s5  ;;  %808 = vrot.lane.b32.xlu0 %v3573_v14, %s3472_s6 }
 0x11d   : > { %1299 = vrot.lane.b32.xlu1 %v3583_v24, %s3471_s5  ;;  %810 = vrot.lane.b32.xlu0 %v3575_v16, %s3472_s6 }
 0x121   : > { %1297 = vrot.lane.b32.xlu1 %v3581_v22, %s3471_s5  ;;  %812 = vrot.lane.b32.xlu0 %v3577_v18, %s3472_s6 }
 0x125   : > { %1295 = vrot.lane.b32.xlu1 %v3579_v20, %s3471_s5  ;;  %814 = vrot.lane.b32.xlu0 %v3579_v20, %s3472_s6 }
 0x129   : > { %1293 = vrot.lane.b32.xlu1 %v3577_v18, %s3471_s5  ;;  %816 = vrot.lane.b32.xlu0 %v3581_v22, %s3472_s6 }
 0x12d   : > { %1291 = vrot.lane.b32.xlu1 %v3575_v16, %s3471_s5  ;;  %818 = vrot.lane.b32.xlu0 %v3583_v24, %s3472_s6 }
 0x131   : > { %1289 = vrot.lane.b32.xlu1 %v3573_v14, %s3471_s5  ;;  %820 = vrot.lane.b32.xlu0 %v3585_v26, %s3472_s6 }
 0x135   : > { %1768 = vrot.lane.b32.xlu1 %v3591_v30, %s3473_s7  ;;  %822 = vrot.lane.b32.xlu0 %v3588_v28, %s3472_s6 }
 0x139   : > { %1766 = vrot.lane.b32.xlu1 %v3588_v28, %s3473_s7  ;;  %824 = vrot.lane.b32.xlu0 %v3591_v30, %s3472_s6  ;;  %s4697_s6 = scalar_lea.vmem %s4724_s4, %s3290_s23 }
 0x13d   : > { %1764 = vrot.lane.b32.xlu1 %v3585_v26, %s3473_s7  ;;  %1271 = vrot.lane.b32.xlu0 %v3573_v14, %s3474_s8 }
 0x141   : > { %1762 = vrot.lane.b32.xlu1 %v3583_v24, %s3473_s7  ;;  %1273 = vrot.lane.b32.xlu0 %v3575_v16, %s3474_s8 }
 0x145   : > { %1760 = vrot.lane.b32.xlu1 %v3581_v22, %s3473_s7  ;;  %1275 = vrot.lane.b32.xlu0 %v3577_v18, %s3474_s8 }
 0x149   : > { %1758 = vrot.lane.b32.xlu1 %v3579_v20, %s3473_s7  ;;  %1277 = vrot.lane.b32.xlu0 %v3579_v20, %s3474_s8 }
 0x14d   : > { %1756 = vrot.lane.b32.xlu1 %v3577_v18, %s3473_s7  ;;  %1279 = vrot.lane.b32.xlu0 %v3581_v22, %s3474_s8 }
 0x151   : > { %1754 = vrot.lane.b32.xlu1 %v3575_v16, %s3473_s7  ;;  %1281 = vrot.lane.b32.xlu0 %v3583_v24, %s3474_s8 }
 0x155   : > { %1752 = vrot.lane.b32.xlu1 %v3573_v14, %s3473_s7  ;;  %1283 = vrot.lane.b32.xlu0 %v3585_v26, %s3474_s8 }
 0x159   : > { %1736 = vrot.lane.b32.xlu1 %v3575_v16, %s3475_s9  ;;  %1285 = vrot.lane.b32.xlu0 %v3588_v28, %s3474_s8 }
 0x15d   : > { %1740 = vrot.lane.b32.xlu1 %v3579_v20, %s3475_s9  ;;  %1287 = vrot.lane.b32.xlu0 %v3591_v30, %s3474_s8 }
 0x15f   : > { %v374_v32 = vpop.permute.xlu1 %373 }
 0x161   : > { %1744 = vrot.lane.b32.xlu1 %v3583_v24, %s3475_s9  ;;  %1734 = vrot.lane.b32.xlu0 %v3573_v14, %s3475_s9 }
 0x163   : > { %v372_v33 = vpop.permute.xlu1 %371 }
 0x165   : > { %1748 = vrot.lane.b32.xlu1 %v3588_v28, %s3475_s9  ;;  %1738 = vrot.lane.b32.xlu0 %v3577_v18, %s3475_s9 }
 0x167   : > { %v368_v34 = vpop.permute.xlu1 %367  ;;  %v378_v35 = vpop.permute.xlu0 %377 }
 0x168   : > { %2888 = vmatpush3.xpose.msk.msra.mxu1 %vm379_vm2, %v378_v35 }
 0x169   : > { %649 = vrot.lane.b32.xlu1 %v3588_v28, %s3476_s10  ;;  %1742 = vrot.lane.b32.xlu0 %v3581_v22, %s3475_s9 }
 0x16a   : > { %2889 = vmatprep.subr.mxu1 %v4725_v1 }
 0x16b   : > { %v364_v36 = vpop.permute.xlu1 %363  ;;  %v376_v37 = vpop.permute.xlu0 %375 }
 0x16c   : > { %2890 = vmatpush3.xpose.msk.msra.mxu1 %vm379_vm2, %v376_v37 }
 0x16d   : > { %643 = vrot.lane.b32.xlu1 %v3581_v22, %s3476_s10  ;;  %1746 = vrot.lane.b32.xlu0 %v3585_v26, %s3475_s9 }
 0x16e   : > { %2891 = vmatprep.subr.mxu1 %v4725_v1 }
 0x16f   : > { %v843_v38 = vpop.permute.xlu1 %842  ;;  %v370_v39 = vpop.permute.xlu0 %369 }
 0x170   : > { %2892 = vmatpush3.xpose.msk.msra.mxu1 %vm379_vm2, %v374_v32 }
 0x171   : > { %635 = vrot.lane.b32.xlu1 %v3573_v14, %s3476_s10  ;;  %647 = vrot.lane.b32.xlu0 %v3585_v26, %s3476_s10 }
 0x172   : > { %2893 = vmatprep.subr.mxu1 %v4725_v1 }
 0x173   : > { %v839_v40 = vpop.permute.xlu1 %838  ;;  %v366_v41 = vpop.permute.xlu0 %365 }
 0x174   : > { %2894 = vmatpush3.xpose.msk.msra.mxu1 %vm379_vm2, %v372_v33 }
 0x175   : > { %1108 = vrot.lane.b32.xlu1 %v3583_v24, %s3477_s11  ;;  %645 = vrot.lane.b32.xlu0 %v3583_v24, %s3476_s10 }
 0x176   : > { %2895 = vmatprep.subr.mxu1 %v4725_v1 }
 0x177   : > { %v3681_v42 = vpop.permute.xlu1 %834  ;;  %v362_v43 = vpop.permute.xlu0 %361 }
 0x178   : > { %2896 = vmatpush3.xpose.msk.msra.mxu1 %vm379_vm2, %v370_v39 }
 0x179   : > { %1106 = vrot.lane.b32.xlu1 %v3581_v22, %s3477_s11  ;;  %1750 = vrot.lane.b32.xlu0 %v3591_v30, %s3475_s9 }
 0x17a   : > { %2897 = vmatprep.subr.mxu1 %v4725_v1 }
 0x17b   : > { %v3689_v44 = vpop.permute.xlu1 %830  ;;  %v841_v45 = vpop.permute.xlu0 %840 }
 0x17c   : > { %2898 = vmatpush3.xpose.msk.msra.mxu1 %vm379_vm2, %v368_v34 }
 0x17d   : > { %1104 = vrot.lane.b32.xlu1 %v3579_v20, %s3477_s11  ;;  %641 = vrot.lane.b32.xlu0 %v3579_v20, %s3476_s10 }
 0x17e   : > { %2899 = vmatprep.subr.mxu1 %v4725_v1 }
 0x17f   : > { %v3697_v46 = vpop.permute.xlu1 %826  ;;  %v837_v47 = vpop.permute.xlu0 %836 }
 0x180   : > { %2900 = vmatpush3.xpose.msk.msra.mxu1 %vm379_vm2, %v366_v41 }
 0x181   : > { %1098 = vrot.lane.b32.xlu1 %v3573_v14, %s3477_s11  ;;  %639 = vrot.lane.b32.xlu0 %v3577_v18, %s3476_s10 }
 0x182   : > { %2901 = vmatprep.subr.mxu1 %v4725_v1 }
 0x183   : > { %v3705_v48 = vpop.permute.xlu1 %1305  ;;  %v833_v49 = vpop.permute.xlu0 %832 }
 0x184   : > { %2902 = vmatpush3.xpose.msk.msra.mxu1 %vm379_vm2, %v364_v36 }
 0x185   : > { %1575 = vrot.lane.b32.xlu1 %v3588_v28, %s3478_s12  ;;  %637 = vrot.lane.b32.xlu0 %v3575_v16, %s3476_s10 }
 0x186   : > { %2903 = vmatprep.subr.mxu1 %v4725_v1 }
 0x187   : > { %v3713_v50 = vpop.permute.xlu1 %1303  ;;  %v829_v51 = vpop.permute.xlu0 %828 }
 0x188   : > { %2904 = vmatpush3.xpose.msk.msra.mxu1 %vm379_vm2, %v362_v43 }
 0x189   : > { %1573 = vrot.lane.b32.xlu1 %v3585_v26, %s3478_s12  ;;  %1112 = vrot.lane.b32.xlu0 %v3588_v28, %s3477_s11 }
 0x18a   : > { %2977 = vmatprep.subr.mxu1 %v4725_v1 }
 0x18b   : > { %2906 = vmatmul.mubr.msk.f32.vlgmr.msra.gmra.mxu1 %vm379_vm2, %v3573_v14  ;;  %v3723_v52 = vpop.permute.xlu0 %808  ;;  %v3728_v53 = vpop.permute.xlu1 %1301 }
 0x18c   : > { %2978 = vmatpush3.xpose.msk.msra.mxu1 %vm379_vm2, %v843_v38  ;;  %2908 = vmatprep.mubr.msk.f32.mxu1 %vm3468_vm0, %v4725_v1 }
 0x18d   : > { %1571 = vrot.lane.b32.xlu1 %v3583_v24, %s3478_s12  ;;  %1110 = vrot.lane.b32.xlu0 %v3585_v26, %s3477_s11 }
 0x18e   : > { %2979 = vmatprep.subr.mxu1 %v4725_v1 }
 0x18f   : > { %2909 = vmatmul.mubr.msk.f32.gmra.mxu1 %vm379_vm2, %v3575_v16  ;;  %v3737_v54 = vpop.permute.xlu0 %810  ;;  %v3747_v55 = vpop.permute.xlu1 %1299 }
 0x190   : > { %2980 = vmatpush3.xpose.msk.msra.mxu1 %vm379_vm2, %v841_v45  ;;  %2911 = vmatprep.mubr.msk.f32.mxu1 %vm3468_vm0, %v4725_v1 }
 0x191   : > { %1567 = vrot.lane.b32.xlu1 %v3579_v20, %s3478_s12  ;;  %651 = vrot.lane.b32.xlu0 %v3591_v30, %s3476_s10 }
 0x192   : > { %2981 = vmatprep.subr.mxu1 %v4725_v1 }
 0x193   : > { %2912 = vmatmul.mubr.msk.f32.gmra.mxu1 %vm379_vm2, %v3577_v18  ;;  %v3751_v56 = vpop.permute.xlu0 %812  ;;  %v3766_v58 = vpop.permute.xlu1 %1297 }
 0x194   : > { %2982 = vmatpush3.xpose.msk.msra.mxu1 %vm379_vm2, %v839_v40  ;;  %2914 = vmatprep.mubr.msk.f32.mxu1 %vm3468_vm0, %v4725_v1 }
 0x195   : > { %1565 = vrot.lane.b32.xlu1 %v3577_v18, %s3478_s12  ;;  %1114 = vrot.lane.b32.xlu0 %v3591_v30, %s3477_s11 }
 0x196   : > { %2983 = vmatprep.subr.mxu1 %v4725_v1 }
 0x197   : > { %2915 = vmatmul.mubr.msk.f32.gmra.mxu1 %vm379_vm2, %v3579_v20  ;;  %v815_v57 = vpop.permute.xlu0 %814  ;;  %v1296_v60 = vpop.permute.xlu1 %1295 }
 0x198   : > { %2984 = vmatpush3.xpose.msk.msra.mxu1 %vm379_vm2, %v837_v47  ;;  %2917 = vmatprep.mubr.msk.f32.mxu1 %vm3468_vm0, %v4725_v1  ;;  %v349_v47 = vlaneseq }
 0x199   : > { %1563 = vrot.lane.b32.xlu1 %v3575_v16, %s3478_s12  ;;  %1102 = vrot.lane.b32.xlu0 %v3577_v18, %s3477_s11 }
 0x19a   : > { %2985 = vmatprep.subr.mxu1 %v4725_v1 }
 0x19b   : > { %2918 = vmatmul.mubr.msk.f32.gmra.mxu1 %vm379_vm2, %v3581_v22  ;;  %v817_v59 = vpop.permute.xlu0 %816  ;;  %v1294_v63 = vpop.permute.xlu1 %1293 }
 0x19c   : > { %2986 = vmatpush3.xpose.msk.msra.mxu1 %vm379_vm2, %v3681_v42  ;;  %2920 = vmatprep.mubr.msk.f32.mxu1 %vm3468_vm0, %v4725_v1 }
 0x19d   : > { %2040 = vrot.lane.b32.xlu1 %v3591_v30, %s3479_s13  ;;  %1100 = vrot.lane.b32.xlu0 %v3575_v16, %s3477_s11 }
 0x19e   : > { %2987 = vmatprep.subr.mxu1 %v4725_v1 }
 0x19f   : > { %2921 = vmatmul.mubr.msk.f32.gmra.mxu1 %vm379_vm2, %v3583_v24  ;;  %v819_v61 = vpop.permute.xlu0 %818  ;;  %v1292_v2 = vpop.permute.xlu1 %1291 }
 0x1a0   : > { %2988 = vmatpush3.xpose.msk.msra.mxu1 %vm379_vm2, %v833_v49  ;;  %2923 = vmatprep.mubr.msk.f32.mxu1 %vm3468_vm0, %v4725_v1 }
 0x1a1   : > { %2032 = vrot.lane.b32.xlu1 %v3581_v22, %s3479_s13  ;;  %1577 = vrot.lane.b32.xlu0 %v3591_v30, %s3478_s12 }
 0x1a2   : > { %2989 = vmatprep.subr.mxu1 %v4725_v1 }
 0x1a3   : > { %2924 = vmatmul.mubr.msk.f32.gmra.mxu1 %vm379_vm2, %v3585_v26  ;;  %v821_v62 = vpop.permute.xlu0 %820  ;;  %v1290_v5 = vpop.permute.xlu1 %1289 }
 0x1a4   : > { %2990 = vmatpush3.xpose.msk.msra.mxu1 %vm379_vm2, %v3689_v44  ;;  %2926 = vmatprep.mubr.msk.f32.mxu1 %vm3468_vm0, %v4725_v1 }
 0x1a5   : > { %1569 = vrot.lane.b32.xlu0 %v3581_v22, %s3478_s12  ;;  %2991 = vmatprep.subr.mxu1 %v4725_v1 }
 0x1a7   : > { %2927 = vmatmul.mubr.msk.f32.gmra.mxu1 %vm379_vm2, %v3588_v28  ;;  %v823_v0 = vpop.permute.xlu0 %822  ;;  %v1769_v7 = vpop.permute.xlu1 %1768 }
 0x1a8   : > { %2992 = vmatpush3.xpose.msk.msra.mxu1 %vm379_vm2, %v829_v51  ;;  %2929 = vmatprep.mubr.msk.f32.mxu1 %vm3468_vm0, %v4725_v1 }
 0x1a9   : > { %1561 = vrot.lane.b32.xlu0 %v3573_v14, %s3478_s12  ;;  %2993 = vmatprep.subr.mxu1 %v4725_v1 }
 0x1ab   : > { %2930 = vmatmul.mubr.msk.f32.gmra.mxu1 %vm379_vm2, %v3591_v30  ;;  %v825_v3 = vpop.permute.xlu0 %824  ;;  %v1767_v10 = vpop.permute.xlu1 %1766 }
 0x1ac   : > { %2994 = vmatpush3.xpose.msk.msra.mxu1 %vm379_vm2, %v3697_v46  ;;  %2995 = vmatprep.mubr.msk.f32.mxu1 %vm3468_vm0, %v4725_v1 }
 0x1ad   : > { %2038 = vrot.lane.b32.xlu0 %v3588_v28, %s3479_s13  ;;  %3067 = vmatprep.subr.mxu1 %v4725_v1 }
 0x1af   : > { %2996 = vmatmul.mubr.msk.f32.vlgmr.msra.gmra.mxu1 %vm379_vm2, %v3723_v52  ;;  %v1272_v4 = vpop.permute.xlu0 %1271  ;;  %v1765_v12 = vpop.permute.xlu1 %1764 }
 0x1b0   : > { %3068 = vmatpush3.xpose.msk.msra.mxu1 %vm379_vm2, %v3705_v48  ;;  %2998 = vmatprep.mubr.msk.f32.mxu1 %vm3468_vm0, %v4725_v1  ;;  %v3965_v48 = vand.u32 127, %v349_v47 }
 0x1b1   : > { %2036 = vrot.lane.b32.xlu0 %v3585_v26, %s3479_s13  ;;  %3069 = vmatprep.subr.mxu1 %v4725_v1 }
 0x1b2   : > { %vm351_vm3 = vcmp.lt.s32.totalorder %v3965_v48, 65 }
 0x1b3   : > { %2999 = vmatmul.mubr.msk.f32.gmra.mxu1 %vm379_vm2, %v3737_v54  ;;  %v1274_v6 = vpop.permute.xlu0 %1273  ;;  %v1763_v17 = vpop.permute.xlu1 %1762 }
 0x1b4   : > { %3070 = vmatpush3.xpose.msk.msra.mxu1 %vm379_vm2, %v3713_v50  ;;  %3001 = vmatprep.mubr.msk.f32.mxu1 %vm3468_vm0, %v4725_v1 }
 0x1b5   : > { %2034 = vrot.lane.b32.xlu0 %v3583_v24, %s3479_s13  ;;  %3071 = vmatprep.subr.mxu1 %v4725_v1 }
 0x1b7   : > { %3002 = vmatmul.mubr.msk.f32.gmra.mxu1 %vm379_vm2, %v3751_v56  ;;  %v1276_v8 = vpop.permute.xlu0 %1275  ;;  %v1761_v21 = vpop.permute.xlu1 %1760 }
 0x1b8   : > { %3072 = vmatpush3.xpose.msk.msra.mxu1 %vm379_vm2, %v3728_v53  ;;  %3004 = vmatprep.mubr.msk.f32.mxu1 %vm3468_vm0, %v4725_v1 }
 0x1b9   : > { %3073 = vmatprep.subr.mxu1 %v4725_v1 }
 0x1bb   : > { %3005 = vmatmul.mubr.msk.f32.gmra.mxu1 %vm379_vm2, %v815_v57  ;;  %v1278_v9 = vpop.permute.xlu0 %1277  ;;  %v1759_v24 = vpop.permute.xlu1 %1758 }
 0x1bc   : > { %3074 = vmatpush3.xpose.msk.msra.mxu1 %vm379_vm2, %v3747_v55  ;;  %3007 = vmatprep.mubr.msk.f32.mxu1 %vm3468_vm0, %v4725_v1 }
 0x1bd   : > { %3075 = vmatprep.subr.mxu1 %v4725_v1 }
 0x1bf   : > { %3008 = vmatmul.mubr.msk.f32.gmra.mxu1 %vm379_vm2, %v817_v59  ;;  %v1280_v11 = vpop.permute.xlu0 %1279  ;;  %v1757_v26 = vpop.permute.xlu1 %1756 }
 0x1c0   : > { %3076 = vmatpush3.xpose.msk.msra.mxu1 %vm379_vm2, %v3766_v58  ;;  %3010 = vmatprep.mubr.msk.f32.mxu1 %vm3468_vm0, %v4725_v1 }
 0x1c1   : > { %3077 = vmatprep.subr.mxu1 %v4725_v1 }
 0x1c3   : > { %3011 = vmatmul.mubr.msk.f32.gmra.mxu1 %vm379_vm2, %v819_v61  ;;  %v1282_v13 = vpop.permute.xlu0 %1281  ;;  %v1755_v29 = vpop.permute.xlu1 %1754 }
 0x1c4   : > { %3078 = vmatpush3.xpose.msk.msra.mxu1 %vm379_vm2, %v1296_v60  ;;  %3013 = vmatprep.mubr.msk.f32.mxu1 %vm3468_vm0, %v4725_v1 }
 0x1c5   : > { %3079 = vmatprep.subr.mxu1 %v4725_v1 }
 0x1c7   : > { %3014 = vmatmul.mubr.msk.f32.gmra.mxu1 %vm379_vm2, %v821_v62  ;;  %v1284_v15 = vpop.permute.xlu0 %1283  ;;  %v1753_v31 = vpop.permute.xlu1 %1752 }
 0x1c8   : > { %3080 = vmatpush3.xpose.msk.msra.mxu1 %vm379_vm2, %v1294_v63  ;;  %3016 = vmatprep.mubr.msk.f32.mxu1 %vm3468_vm0, %v4725_v1 }
 0x1c9   : > { %3081 = vmatprep.subr.mxu1 %v4725_v1 }
 0x1cb   : > { %3017 = vmatmul.mubr.msk.f32.gmra.mxu1 %vm379_vm2, %v823_v0  ;;  %v1286_v19 = vpop.permute.xlu0 %1285  ;;  %v1737_v34 = vpop.permute.xlu1 %1736 }
 0x1cc   : > { %3082 = vmatpush3.xpose.msk.msra.mxu1 %vm379_vm2, %v1292_v2  ;;  %3019 = vmatprep.mubr.msk.f32.mxu1 %vm3468_vm0, %v4725_v1 }
 0x1cd   : > { %3083 = vmatprep.subr.mxu1 %v4725_v1 }
 0x1cf   : > { %3020 = vmatmul.mubr.msk.f32.gmra.mxu1 %vm379_vm2, %v825_v3  ;;  %v1288_v22 = vpop.permute.xlu0 %1287  ;;  %v1741_v36 = vpop.permute.xlu1 %1740 }
 0x1d0   : > { %3084 = vmatpush3.xpose.msk.msra.mxu1 %vm379_vm2, %v1290_v5  ;;  %3085 = vmatprep.mubr.msk.f32.mxu1 %vm3468_vm0, %v4725_v1 }
 0x1d1   : > { %3157 = vmatprep.subr.mxu1 %v4725_v1 }
 0x1d3   : > { %3086 = vmatmul.mubr.msk.f32.vlgmr.msra.gmra.mxu1 %vm379_vm2, %v1272_v4  ;;  %v1735_v23 = vpop.permute.xlu0 %1734  ;;  %v1745_v39 = vpop.permute.xlu1 %1744 }
 0x1d4   : > { %3158 = vmatpush3.xpose.msk.msra.mxu1 %vm379_vm2, %v1769_v7  ;;  %3088 = vmatprep.mubr.msk.f32.mxu1 %vm3468_vm0, %v4725_v1 }
 0x1d5   : > { %3159 = vmatprep.subr.mxu1 %v4725_v1 }
 0x1d7   : > { %3089 = vmatmul.mubr.msk.f32.gmra.mxu1 %vm379_vm2, %v1274_v6  ;;  %v1739_v25 = vpop.permute.xlu0 %1738  ;;  %v1749_v41 = vpop.permute.xlu1 %1748 }
 0x1d8   : > { %3160 = vmatpush3.xpose.msk.msra.mxu1 %vm379_vm2, %v1767_v10  ;;  %3091 = vmatprep.mubr.msk.f32.mxu1 %vm3468_vm0, %v4725_v1 }
 0x1d9   : > { %3161 = vmatprep.subr.mxu1 %v4725_v1 }
 0x1db   : > { %3092 = vmatmul.mubr.msk.f32.gmra.mxu1 %vm379_vm2, %v1276_v8  ;;  %v1743_v27 = vpop.permute.xlu0 %1742  ;;  %v650_v44 = vpop.permute.xlu1 %649 }
 0x1dc   : > { %3162 = vmatpush3.xpose.msk.msra.mxu1 %vm379_vm2, %v1765_v12  ;;  %3094 = vmatprep.mubr.msk.f32.mxu1 %vm3468_vm0, %v4725_v1 }
 0x1dd   : > { %3163 = vmatprep.subr.mxu1 %v4725_v1 }
 0x1df   : > { %3095 = vmatmul.mubr.msk.f32.gmra.mxu1 %vm379_vm2, %v1278_v9  ;;  %v3893_v28 = vpop.permute.xlu0 %1746  ;;  %v644_v45 = vpop.permute.xlu1 %643 }
 0x1e0   : > { %3164 = vmatpush3.xpose.msk.msra.mxu1 %vm379_vm2, %v1763_v17  ;;  %3097 = vmatprep.mubr.msk.f32.mxu1 %vm3468_vm0, %v4725_v1 }
 0x1e1   : > { %3165 = vmatprep.subr.mxu1 %v4725_v1 }
 0x1e3   : > { %3098 = vmatmul.mubr.msk.f32.gmra.mxu1 %vm379_vm2, %v1280_v11  ;;  %v648_v30 = vpop.permute.xlu0 %647  ;;  %v636_v46 = vpop.permute.xlu1 %635 }
 0x1e4   : > { %3166 = vmatpush3.xpose.msk.msra.mxu1 %vm379_vm2, %v1761_v21  ;;  %3100 = vmatprep.mubr.msk.f32.mxu1 %vm3468_vm0, %v4725_v1 }
 0x1e5   : > { %3167 = vmatprep.subr.mxu1 %v4725_v1 }
 0x1e7   : > { %3101 = vmatmul.mubr.msk.f32.gmra.mxu1 %vm379_vm2, %v1282_v13  ;;  %v646_v32 = vpop.permute.xlu0 %645 }
 0x1e8   : > { %3168 = vmatpush3.xpose.msk.msra.mxu1 %vm379_vm2, %v1759_v24  ;;  %3103 = vmatprep.mubr.msk.f32.mxu1 %vm3468_vm0, %v4725_v1 }
 0x1e9   : > { %3169 = vmatprep.subr.mxu1 %v4725_v1 }
 0x1eb   : > { %3104 = vmatmul.mubr.msk.f32.gmra.mxu1 %vm379_vm2, %v1284_v15  ;;  %v1751_v33 = vpop.permute.xlu0 %1750 }
 0x1ec   : > { %3170 = vmatpush3.xpose.msk.msra.mxu1 %vm379_vm2, %v1757_v26  ;;  %3106 = vmatprep.mubr.msk.f32.mxu1 %vm3468_vm0, %v4725_v1 }
 0x1ed   : > { %3171 = vmatprep.subr.mxu1 %v4725_v1 }
 0x1ef   : > { %3107 = vmatmul.mubr.msk.f32.gmra.mxu1 %vm379_vm2, %v1286_v19  ;;  %v642_v35 = vpop.permute.xlu0 %641 }
 0x1f0   : > { %3172 = vmatpush3.xpose.msk.msra.mxu1 %vm379_vm2, %v1755_v29  ;;  %3109 = vmatprep.mubr.msk.f32.mxu1 %vm3468_vm0, %v4725_v1 }
 0x1f1   : > { %3173 = vmatprep.subr.mxu1 %v4725_v1 }
 0x1f3   : > { %3110 = vmatmul.mubr.msk.f32.gmra.mxu1 %vm379_vm2, %v1288_v22  ;;  %v640_v37 = vpop.permute.xlu0 %639 }
 0x1f4   : > { %3174 = vmatpush3.xpose.msk.msra.mxu1 %vm379_vm2, %v1753_v31  ;;  %3175 = vmatprep.mubr.msk.f32.mxu1 %vm3468_vm0, %v4725_v1 }
 0x1f5   : > { %3282 = vmatprep.subr.mxu1 %v4725_v1 }
 0x1f7   : > { %3176 = vmatmul.mubr.msk.f32.vlgmr.msra.gmra.mxu1 %vm379_vm2, %v1735_v23  ;;  %v638_v38 = vpop.permute.xlu0 %637 }
 0x1f8   : > { %3178 = vmatprep.mubr.msk.f32.mxu1 %vm3468_vm0, %v4725_v1 }
 0x1fb   : > { %3179 = vmatmul.mubr.msk.f32.gmra.mxu1 %vm379_vm2, %v1737_v34  ;;  %v3928_v40 = vpop.permute.xlu0 %1112 }
 0x1fc   : > { %3181 = vmatprep.mubr.msk.f32.mxu1 %vm3468_vm0, %v4725_v1 }
 0x1ff   : > { %3182 = vmatmul.mubr.msk.f32.gmra.mxu1 %vm379_vm2, %v1739_v25  ;;  %v3933_v42 = vpop.permute.xlu0 %1110 }
 0x200   : > { %3184 = vmatprep.mubr.msk.f32.mxu1 %vm3468_vm0, %v4725_v1 }
 0x203   : > { %3185 = vmatmul.mubr.msk.f32.gmra.mxu1 %vm379_vm2, %v1741_v36  ;;  %v652_v43 = vpop.permute.xlu0 %651 }
 0x204   : > { %2933 = vmatpush3.msra.mxu0 %v652_v43  ;;  %3187 = vmatprep.mubr.msk.f32.mxu1 %vm3468_vm0, %v4725_v1 }
 0x205   : > { %2934 = vmatprep.subr.mxu0 %v4725_v1 }
 0x206   : > { %2935 = vmatpush3.msra.mxu0 %v650_v44 }
 0x207   : > { %2936 = vmatprep.subr.mxu0 %v4725_v1  ;;  %3188 = vmatmul.mubr.msk.f32.gmra.mxu1 %vm379_vm2, %v1743_v27 }
 0x208   : > { %2937 = vmatpush3.msra.mxu0 %v648_v30  ;;  %3190 = vmatprep.mubr.msk.f32.mxu1 %vm3468_vm0, %v4725_v1 }
 0x209   : > { %2938 = vmatprep.subr.mxu0 %v4725_v1 }
 0x20a   : > { %2939 = vmatpush3.msra.mxu0 %v646_v32 }
 0x20b   : > { %2940 = vmatprep.subr.mxu0 %v4725_v1  ;;  %3191 = vmatmul.mubr.msk.f32.gmra.mxu1 %vm379_vm2, %v1745_v39 }
 0x20c   : > { %2941 = vmatpush3.msra.mxu0 %v644_v45  ;;  %3193 = vmatprep.mubr.msk.f32.mxu1 %vm3468_vm0, %v4725_v1 }
 0x20d   : > { %2942 = vmatprep.subr.mxu0 %v4725_v1 }
 0x20e   : > { %2943 = vmatpush3.msra.mxu0 %v642_v35 }
 0x20f   : > { %2944 = vmatprep.subr.mxu0 %v4725_v1  ;;  %3194 = vmatmul.mubr.msk.f32.gmra.mxu1 %vm379_vm2, %v3893_v28 }
 0x210   : > { %2945 = vmatpush3.msra.mxu0 %v640_v37  ;;  %3196 = vmatprep.mubr.msk.f32.mxu1 %vm3468_vm0, %v4725_v1 }
 0x211   : > { %2946 = vmatprep.subr.mxu0 %v4725_v1 }
 0x212   : > { %2947 = vmatpush3.msra.mxu0 %v638_v38 }
 0x213   : > { %2948 = vmatprep.subr.mxu0 %v4725_v1  ;;  %3197 = vmatmul.mubr.msk.f32.gmra.mxu1 %vm379_vm2, %v1749_v41 }
 0x214   : > { %2949 = vmatpush3.msra.mxu0 %v636_v46  ;;  %3199 = vmatprep.mubr.msk.f32.mxu1 %vm3468_vm0, %v4725_v1 }
 0x215   : > { %3022 = vmatprep.subr.mxu0 %v4725_v1 }
 0x217   : > { %3200 = vmatmul.mubr.msk.f32.gmra.mxu1 %vm379_vm2, %v1751_v33 }
 0x218   : > { %3264 = vmatprep.mubr.msk.f32.mxu1 %vm3468_vm0, %v4725_v1 }
 0x24b   : > { %v482_v49 = vpop.f32.mrf.mxu1 }
 0x24c   : > { %v526_v50 = vmul.f32 0.35355338, %v482_v49 }
 0x24d   : > { %v2907_v51 = vpop.f32.mrf.mxu1 }
 0x24e   : > { %v3970_v52 = vsel %vm351_vm3, %v526_v50, -1e+30 }
 0x24f   : > { %v487_v53 = vpop.f32.mrf.mxu1  ;;  %v545_v54 = vsel %vm544_vm4, %v3970_v52, -inf }
 0x250   : > { %v527_v55 = vmul.f32 0.35355338, %v487_v53  ;;  %546 = vmax.xlane.f32.xlu1 %v545_v54 }
 0x251   : > { %v2910_v56 = vpop.f32.mrf.mxu1 }
 0x252   : > { %v3976_v57 = vsel %vm351_vm3, %v527_v55, -1e+30 }
 0x253   : > { %v492_v58 = vpop.f32.mrf.mxu1  ;;  %v548_v59 = vsel %vm544_vm4, %v3976_v57, -inf }
 0x254   : > { %v528_v60 = vmul.f32 0.35355338, %v492_v58  ;;  %549 = vmax.xlane.f32.xlu0 %v548_v59 }
 0x255   : > { %v2913_v61 = vpop.f32.mrf.mxu1 }
 0x256   : > { %v3982_v62 = vsel %vm351_vm3, %v528_v60, -1e+30  ;;  %v4032_v61 = vpop.permute.xlu1 %1108 }
 0x257   : > { %v497_v63 = vpop.f32.mrf.mxu1  ;;  %v551_v0 = vsel %vm544_vm4, %v3982_v62, -inf }
 0x258   : > { %v529_v2 = vmul.f32 0.35355338, %v497_v63  ;;  %552 = vmax.xlane.f32.xlu0 %v551_v0 }
 0x259   : > { %v2916_v3 = vpop.f32.mrf.mxu1 }
 0x25a   : > { %v3988_v4 = vsel %vm351_vm3, %v529_v2, -1e+30  ;;  %v4034_v3 = vpop.permute.xlu1 %1106 }
 0x25b   : > { %v502_v5 = vpop.f32.mrf.mxu1  ;;  %v554_v6 = vsel %vm544_vm4, %v3988_v4, -inf }
 0x25c   : > { %v530_v7 = vmul.f32 0.35355338, %v502_v5  ;;  %555 = vmax.xlane.f32.xlu1 %v554_v6 }
 0x25d   : > { %v2919_v8 = vpop.f32.mrf.mxu1 }
 0x25e   : > { %v3994_v9 = vsel %vm351_vm3, %v530_v7, -1e+30  ;;  %v4038_v8 = vpop.permute.xlu1 %1104 }
 0x25f   : > { %v507_v10 = vpop.f32.mrf.mxu1  ;;  %v557_v11 = vsel %vm544_vm4, %v3994_v9, -inf }
 0x260   : > { %v531_v12 = vmul.f32 0.35355338, %v507_v10  ;;  %558 = vmax.xlane.f32.xlu1 %v557_v11 }
 0x261   : > { %v2922_v13 = vpop.f32.mrf.mxu1 }
 0x262   : > { %v4000_v15 = vsel %vm351_vm3, %v531_v12, -1e+30 }
 0x263   : > { %v512_v17 = vpop.f32.mrf.mxu1  ;;  %v560_v19 = vsel %vm544_vm4, %v4000_v15, -inf }
 0x264   : > { %v532_v21 = vmul.f32 0.35355338, %v512_v17  ;;  %561 = vmax.xlane.f32.xlu0 %v560_v19 }
 0x265   : > { %v2925_v22 = vpop.f32.mrf.mxu1 }
 0x266   : > { %v4006_v23 = vsel %vm351_vm3, %v532_v21, -1e+30  ;;  %v4050_v22 = vpop.permute.xlu1 %1098 }
 0x267   : > { %v517_v24 = vpop.f32.mrf.mxu1  ;;  %v563_v25 = vsel %vm544_vm4, %v4006_v23, -inf }
 0x268   : > { %v533_v26 = vmul.f32 0.35355338, %v517_v24  ;;  %564 = vmax.xlane.f32.xlu1 %v563_v25 }
 0x269   : > { %v2928_v27 = vpop.f32.mrf.mxu1 }
 0x26a   : > { %v4012_v28 = vsel %vm351_vm3, %v533_v26, -1e+30 }
 0x26b   : > { %v522_v29 = vpop.f32.mrf.mxu1  ;;  %v566_v30 = vsel %vm544_vm4, %v4012_v28, -inf }
 0x26c   : > { %v534_v31 = vmul.f32 0.35355338, %v522_v29  ;;  %567 = vmax.xlane.f32.xlu0 %v566_v30  ;;  %v4060_v30 = vpop.permute.xlu0 %1114 }
 0x26d   : > { %v2931_v32 = vpop.f32.mrf.mxu1 }
 0x26e   : > { %v4018_v33 = vsel %vm351_vm3, %v534_v31, -1e+30 }
 0x26f   : > { %v946_v34 = vpop.f32.mrf.mxu1  ;;  %v569_v35 = vsel %vm544_vm4, %v4018_v33, -inf }
 0x270   : > { %v990_v36 = vmul.f32 0.35355338, %v946_v34  ;;  %570 = vmax.xlane.f32.xlu0 %v569_v35 }
 0x271   : > { %v2997_v37 = vpop.f32.mrf.mxu1 }
 0x272   : > { %v4024_v38 = vsel %vm351_vm3, %v990_v36, -1e+30 }
 0x273   : > { %v951_v39 = vpop.f32.mrf.mxu1  ;;  %v1008_v41 = vsel %vm544_vm4, %v4024_v38, -inf }
 0x274   : > { %1009 = vmax.xlane.f32.xlu1 %v1008_v41  ;;  %v4074_v41 = vpop.permute.xlu1 %1575 }
 0x275   : > { %v3000_v43 = vpop.f32.mrf.mxu1 }
 0x277   : > { %v956_v44 = vpop.f32.mrf.mxu1 }
 0x278   : > { %v992_v11 = vmul.f32 0.35355338, %v956_v44 }
 0x279   : > { %v3003_v45 = vpop.f32.mrf.mxu1 }
 0x27a   : > { %v4054_v24 = vsel %vm351_vm3, %v992_v11, -1e+30 }
 0x27b   : > { %v961_v46 = vpop.f32.mrf.mxu1  ;;  %v1014_v32 = vsel %vm544_vm4, %v4054_v24, -inf }
 0x27c   : > { %v993_v19 = vmul.f32 0.35355338, %v961_v46 }
 0x27d   : > { %v3006_v47 = vpop.f32.mrf.mxu1 }
 0x27e   : > { %v4064_v31 = vsel %vm351_vm3, %v993_v19, -1e+30 }
 0x27f   : > { %v966_v49 = vpop.f32.mrf.mxu1  ;;  %v1017_v45 = vsel %vm544_vm4, %v4064_v31, -inf }
 0x280   : > { %v994_v12 = vmul.f32 0.35355338, %v966_v49 }
 0x281   : > { %v3009_v50 = vpop.f32.mrf.mxu1 }
 0x282   : > { %v4058_v25 = vsel %vm351_vm3, %v994_v12, -1e+30 }
 0x283   : > { %v971_v51 = vpop.f32.mrf.mxu1  ;;  %v1020_v34 = vsel %vm544_vm4, %v4058_v25, -inf }
 0x284   : > { %v995_v35 = vmul.f32 0.35355338, %v971_v51 }
 0x285   : > { %2030 = vrot.lane.b32.xlu1 %v3579_v20, %s3479_s13  ;;  %v3012_v53 = vpop.f32.mrf.mxu1  ;;  %v991_v20 = vmul.f32 0.35355338, %v951_v39 }
 0x286   : > { %2028 = vrot.lane.b32.xlu0 %v3577_v18, %s3479_s13  ;;  %v4084_v47 = vsel %vm351_vm3, %v995_v35, -1e+30  ;;  %v4090_v53 = vpop.permute.xlu0 %1102 }
 0x287   : > { %v976_v54 = vpop.f32.mrf.mxu1  ;;  %v4044_v10 = vsel %vm351_vm3, %v991_v20, -1e+30 }
 0x288   : > { %v1011_v21 = vsel %vm544_vm4, %v4044_v10, -inf  ;;  %v996_v26 = vmul.f32 0.35355338, %v976_v54 }
 0x289   : > { %v3015_v55 = vpop.f32.mrf.mxu1 }
 0x28a   : > { %v4072_v36 = vsel %vm351_vm3, %v996_v26, -1e+30  ;;  %v4106_v11 = vpop.permute.xlu0 %1100 }
 0x28b   : > { %v981_v56 = vpop.f32.mrf.mxu1  ;;  %v1026_v46 = vsel %vm544_vm4, %v4072_v36, -inf }
 0x28c   : > { %v997_v44 = vmul.f32 0.35355338, %v981_v56  ;;  %v1023_v56 = vsel %vm544_vm4, %v4084_v47, -inf }
 0x28d   : > { %v3018_v58 = vpop.f32.mrf.mxu1 }
 0x28e   : > { %v4094_v55 = vsel %vm351_vm3, %v997_v44, -1e+30  ;;  %v4131_v44 = vpop.permute.xlu0 %1577 }
 0x28f   : > { %v986_v59 = vpop.f32.mrf.mxu1  ;;  %v1029_v12 = vsel %vm544_vm4, %v4094_v55, -inf }
 0x290   : > { %v998_v37 = vmul.f32 0.35355338, %v986_v59  ;;  %v4100_v59 = vpop.permute.xlu1 %1573 }
 0x291   : > { %v3021_v60 = vpop.f32.mrf.mxu1 }
 0x292   : > { %v4088_v49 = vsel %vm351_vm3, %v998_v37, -1e+30 }
 0x293   : > { %v1409_v63 = vpop.f32.mrf.mxu1  ;;  %v1032_v58 = vsel %vm544_vm4, %v4088_v49, -inf }
 0x294   : > { %v1453_v60 = vmul.f32 0.35355338, %v1409_v63 }
 0x295   : > { %v3087_v0 = vpop.f32.mrf.mxu1 }
 0x296   : > { %v4114_v63 = vsel %vm351_vm3, %v1453_v60, -1e+30 }
 0x297   : > { %v1414_v2 = vpop.f32.mrf.mxu1 }
 0x298   : > { %v1454_v19 = vmul.f32 0.35355338, %v1414_v2 }
 0x299   : > { %v3090_v5 = vpop.f32.mrf.mxu1 }
 0x29a   : > { %v4128_v2 = vsel %vm351_vm3, %v1454_v19, -1e+30 }
 0x29b   : > { %v4036_v6 = vpop.f32.mrf.mxu1 }
 0x29c   : > { %v1455_v37 = vmul.f32 0.35355338, %v4036_v6 }
 0x29d   : > { %v3093_v7 = vpop.f32.mrf.mxu1 }
 0x29e   : > { %v4145_v6 = vsel %vm351_vm3, %v1455_v37, -1e+30 }
 0x29f   : > { %v4040_v18 = vpop.f32.mrf.mxu1 }
 0x2a1   : > { %v3096_v13 = vpop.f32.mrf.mxu1 }
 0x2a3   : > { %v4046_v17 = vpop.f32.mrf.mxu1 }
 0x2a5   : > { %1012 = vmax.xlane.f32.xlu0 %v1011_v21  ;;  %v3099_v27 = vpop.f32.mrf.mxu1 }
 0x2a6   : > { %v4120_v27 = vpop.permute.xlu1 %1571 }
 0x2a7   : > { %v1434_v29 = vpop.f32.mrf.mxu1 }
 0x2a8   : > { %v1458_v50 = vmul.f32 0.35355338, %v1434_v29 }
 0x2a9   : > { %1015 = vmax.xlane.f32.xlu0 %v1014_v32  ;;  %1021 = vmax.xlane.f32.xlu1 %v1020_v34  ;;  %v3102_v39 = vpop.f32.mrf.mxu1  ;;  %v1471_v34 = vsel %vm544_vm4, %v4114_v63, -inf }
 0x2aa   : > { %v4104_v0 = vsel %vm351_vm3, %v1458_v50, -1e+30 }
 0x2ab   : > { %v4076_v43 = vpop.f32.mrf.mxu1  ;;  %v1486_v13 = vsel %vm544_vm4, %v4104_v0, -inf }
 0x2ad   : > { %1018 = vmax.xlane.f32.xlu0 %v1017_v45  ;;  %1027 = vmax.xlane.f32.xlu1 %v1026_v46  ;;  %v3105_v51 = vpop.f32.mrf.mxu1 }
 0x2af   : > { %v1444_v54 = vpop.f32.mrf.mxu1 }
 0x2b0   : > { %v1460_v5 = vmul.f32 0.35355338, %v1444_v54  ;;  %v1474_v54 = vsel %vm544_vm4, %v4128_v2, -inf }
 0x2b1   : > { %1024 = vmax.xlane.f32.xlu0 %v1023_v56  ;;  %1033 = vmax.xlane.f32.xlu1 %v1032_v58  ;;  %v3108_v20 = vpop.f32.mrf.mxu1  ;;  %v4141_v56 = vpop.permute.xlu1 %1567  ;;  %v1456_v58 = vmul.f32 0.35355338, %v4040_v18 }
 0x2b2   : > { %v4118_v21 = vsel %vm351_vm3, %v1460_v5, -1e+30 }
 0x2b3   : > { %v1449_v7 = vpop.f32.mrf.mxu1  ;;  %v1492_v35 = vsel %vm544_vm4, %v4118_v21, -inf  ;;  %v4160_v18 = vsel %vm351_vm3, %v1456_v58, -1e+30 }
 0x2b5   : > { %1030 = vmax.xlane.f32.xlu0 %v1029_v12  ;;  %1487 = vmax.xlane.f32.xlu1 %v1486_v13  ;;  %v3111_v26 = vpop.f32.mrf.mxu1  ;;  %v4154_v13 = vpop.permute.xlu0 %1569 }
 0x2b6   : > { %v1477_v26 = vsel %vm544_vm4, %v4145_v6, -inf }
 0x2b7   : > { %v1872_v29 = vpop.f32.mrf.mxu1 }
 0x2b8   : > { %v1916_v32 = vmul.f32 0.35355338, %v1872_v29  ;;  %v1457_v29 = vmul.f32 0.35355338, %v4046_v17 }
 0x2b9   : > { %1472 = vmax.xlane.f32.xlu0 %v1471_v34  ;;  %1493 = vmax.xlane.f32.xlu1 %v1492_v35  ;;  %v3177_v39 = vpop.f32.mrf.mxu1  ;;  %v4167_v35 = vpop.permute.xlu1 %1565 }
 0x2ba   : > { %v4135_v45 = vsel %vm351_vm3, %v1916_v32, -1e+30  ;;  %v4175_v17 = vsel %vm351_vm3, %v1457_v29, -1e+30  ;;  %v4178_v58 = vpop.permute.xlu0 %1561 }
 0x2bb   : > { %v1877_v46 = vpop.f32.mrf.mxu1  ;;  %v1934_v50 = vsel %vm544_vm4, %v4135_v45, -inf }
 0x2bc   : > { %v1917_v51 = vmul.f32 0.35355338, %v1877_v46 }
 0x2bd   : > { %1475 = vmax.xlane.f32.xlu0 %v1474_v54  ;;  %1935 = vmax.xlane.f32.xlu1 %v1934_v50  ;;  %v3180_v60 = vpop.f32.mrf.mxu1  ;;  %v1480_v50 = vsel %vm544_vm4, %v4160_v18, -inf  ;;  %v4188_v29 = vpop.permute.xlu1 %1563 }
 0x2be   : > { %v4150_v5 = vsel %vm351_vm3, %v1917_v51, -1e+30  ;;  %v1459_v51 = vmul.f32 0.35355338, %v4076_v43 }
 0x2bf   : > { %v1882_v20 = vpop.f32.mrf.mxu1  ;;  %v1937_v12 = vsel %vm544_vm4, %v4150_v5, -inf }
 0x2c0   : > { %v1918_v19 = vmul.f32 0.35355338, %v1882_v20  ;;  %v4192_v43 = vsel %vm351_vm3, %v1459_v51, -1e+30 }
 0x2c1   : > { %1478 = vmax.xlane.f32.xlu0 %v1477_v26  ;;  %1938 = vmax.xlane.f32.xlu1 %v1937_v12  ;;  %v3183_v32 = vpop.f32.mrf.mxu1  ;;  %v1483_v26 = vsel %vm544_vm4, %v4175_v17, -inf }
 0x2c2   : > { %v4165_v34 = vsel %vm351_vm3, %v1918_v19, -1e+30  ;;  %v1461_v32 = vmul.f32 0.35355338, %v1449_v7 }
 0x2c3   : > { %4733 = vst [vmem:[#allocation2_spill] sm:$0xff] %v4165_v34  ;;  %v1887_v37 = vpop.f32.mrf.mxu1  ;;  %v1940_v39 = vsel %vm544_vm4, %v4165_v34, -inf }
 0x2c4   : > { %v1919_v46 = vmul.f32 0.35355338, %v1887_v37  ;;  %v4206_v51 = vsel %vm351_vm3, %v1461_v32, -1e+30 }
 0x2c5   : > { %1481 = vmax.xlane.f32.xlu0 %v1480_v50  ;;  %1941 = vmax.xlane.f32.xlu1 %v1940_v39  ;;  %v3186_v54 = vpop.f32.mrf.mxu1  ;;  %4737 = vst [vmem:[#allocation6_spill] sm:$0xff] %v4206_v51  ;;  %v1495_v1 = vsel %vm544_vm4, %v4206_v51, -inf }
 0x2c6   : > { %v4182_v60 = vsel %vm351_vm3, %v1919_v46, -1e+30  ;;  %v4200_v54 = vpop.permute.xlu0 %2038 }
 0x2c7   : > { %4734 = vst [vmem:[#allocation3_spill] sm:$0xff] %v4182_v60  ;;  %v1892_v20 = vpop.f32.mrf.mxu1  ;;  %v1943_v12 = vsel %vm544_vm4, %v4182_v60, -inf  ;;  %4736 = vst [vmem:[#allocation5_spill] sm:$0xff] %v4200_v54 }
 0x2c8   : > { %v1920_v19 = vmul.f32 0.35355338, %v1892_v20  ;;  %v1489_v20 = vsel %vm544_vm4, %v4192_v43, -inf }
 0x2c9   : > { %1484 = vmax.xlane.f32.xlu0 %v1483_v26  ;;  %1944 = vmax.xlane.f32.xlu1 %v1943_v12  ;;  %v3189_v37 = vpop.f32.mrf.mxu1  ;;  %v4208_v26 = vpop.permute.xlu1 %2040 }
 0x2ca   : > { %v4196_v39 = vsel %vm351_vm3, %v1920_v19, -1e+30  ;;  %4738 = vst [vmem:[#allocation7_spill] sm:$0xff] %v4208_v26 }
 0x2cb   : > { %4735 = vst [vmem:[#allocation4_spill] sm:$0xff] %v4196_v39  ;;  %v1897_v46 = vpop.f32.mrf.mxu1  ;;  %v1946_v50 = vsel %vm544_vm4, %v4196_v39, -inf  ;;  %v4216_v39 = vpop.permute.xlu0 %2036 }
 0x2cc   : > { %v1921_v7 = vmul.f32 0.35355338, %v1897_v46  ;;  %4740 = vst [vmem:[#allocation9_spill] sm:$0xff] %v4216_v39 }
 0x2cd   : > { %1490 = vmax.xlane.f32.xlu0 %v1489_v20  ;;  %1947 = vmax.xlane.f32.xlu1 %v1946_v50  ;;  %v3192_v12 = vpop.f32.mrf.mxu1 }
 0x2ce   : > { %v4214_v34 = vsel %vm351_vm3, %v1921_v7, -1e+30  ;;  %v4228_v12 = vpop.permute.xlu1 %2032 }
 0x2cf   : > { %v1902_v19 = vpop.f32.mrf.mxu1  ;;  %4739 = vst [vmem:[#allocation8_spill] sm:$0xff] %v4214_v34  ;;  %v1949_v20 = vsel %vm544_vm4, %v4214_v34, -inf  ;;  %4742 = vst [vmem:[#allocation11_spill] sm:$0xff] %v4228_v12  ;;  %v4232_v7 = vpop.permute.xlu0 %2034 }
 0x2d0   : > { %v1922_v37 = vmul.f32 0.35355338, %v1902_v19 }
 0x2d1   : > { %1496 = vmax.xlane.f32.xlu0 %v1495_v1  ;;  %v3195_v54 = vpop.f32.mrf.mxu1 }
 0x2d2   : > { %v4220_v32 = vsel %vm351_vm3, %v1922_v37, -1e+30 }
 0x2d3   : > { %4741 = vst [vmem:[#allocation10_spill] sm:$0xff] %v4220_v32  ;;  %v4222_v46 = vpop.f32.mrf.mxu1  ;;  %v1952_v50 = vsel %vm544_vm4, %v4220_v32, -inf }
 0x2d4   : > { %1953 = vmax.xlane.f32.xlu1 %v1952_v50 }
 0x2d5   : > { %1950 = vmax.xlane.f32.xlu0 %v1949_v20  ;;  %v3198_v1 = vpop.f32.mrf.mxu1 }
 0x2d7   : > { %v4230_v54 = vpop.f32.mrf.mxu1 }
 0x2d9   : > { %v547_v19 = vpop.xlane.xlu1 %546  ;;  %v3201_v37 = vpop.f32.mrf.mxu1 }
 0x2da   : > { %v572_v39 = vsub.f32 %v3970_v52, %v547_v19 }
 0x2dc   : > { %v581_v26 = vmul.f32 1.442695, %v572_v39 }
 0x2dd   : > { %v550_v60 = vpop.xlane.xlu0 %549 }
 0x2de   : > { %3315 = vpow2.f32 %v581_v26  ;;  %v573_v50 = vsub.f32 %v3976_v57, %v550_v60 }
 0x2e0   : > { %v583_v32 = vmul.f32 1.442695, %v573_v50 }
 0x2e1   : > { %v553_v51 = vpop.xlane.xlu0 %552 }
 0x2e2   : > { %3317 = vpow2.f32 %v583_v32  ;;  %v574_v34 = vsub.f32 %v3982_v62, %v553_v51  ;;  %v4743_v62 = vmov 0.0  }
 0x2e4   : > { %v585_v20 = vmul.f32 1.442695, %v574_v34 }
 0x2e5   : > { %v556_v1 = vpop.xlane.xlu1 %555  ;;  %2024 = vrot.lane.b32.xlu1 %v3573_v14, %s3479_s13 }
 0x2e6   : > { %3319 = vpow2.f32 %v585_v20  ;;  %v575_v37 = vsub.f32 %v3988_v4, %v556_v1 }
 0x2e8   : > { %v587_v12 = vmul.f32 1.442695, %v575_v37 }
 0x2e9   : > { %v559_v52 = vpop.xlane.xlu1 %558 }
 0x2ea   : > { %3321 = vpow2.f32 %v587_v12  ;;  %v576_v39 = vsub.f32 %v3994_v9, %v559_v52  ;;  %v1924_v12 = vmul.f32 0.35355338, %v4230_v54 }
 0x2eb   : > { %v4241_v26 = vpop.eup %3315  ;;  %2026 = vrot.lane.b32.xlu0 %v3575_v16, %s3479_s13 }
 0x2ec   : > { %v589_v57 = vmul.f32 1.442695, %v576_v39  ;;  %2951 = vmatmul.mubr.msk.f32.vlgmr.msra.gmra.mxu0 %vm544_vm4, %v4241_v26 }
 0x2ed   : > { %3023 = vmatpush3.msra.mxu0 %v4060_v30  ;;  %v562_v14 = vpop.xlane.xlu0 %561  ;;  %2953 = vmatprep.mubr.msk.f32.mxu0 %vm3468_vm0, %v4743_v62 }
 0x2ee   : > { %3323 = vpow2.f32 %v589_v57  ;;  %3024 = vmatprep.subr.mxu0 %v4743_v62  ;;  %v577_v4 = vsub.f32 %v4000_v15, %v562_v14 }
 0x2ef   : > { %v4252_v9 = vpop.eup %3317  ;;  %3025 = vmatpush3.msra.mxu0 %v3928_v40 }
 0x2f0   : > { %v591_v16 = vmul.f32 1.442695, %v577_v4  ;;  %3026 = vmatprep.subr.mxu0 %v4743_v62  ;;  %2954 = vmatmul.mubr.msk.f32.gmra.mxu0 %vm544_vm4, %v4252_v9 }
 0x2f1   : > { %3027 = vmatpush3.msra.mxu0 %v3933_v42  ;;  %v565_v30 = vpop.xlane.xlu1 %564  ;;  %2956 = vmatprep.mubr.msk.f32.mxu0 %vm3468_vm0, %v4743_v62 }
 0x2f2   : > { %3325 = vpow2.f32 %v591_v16  ;;  %v578_v34 = vsub.f32 %v4006_v23, %v565_v30  ;;  %3028 = vmatprep.subr.mxu0 %v4743_v62 }
 0x2f3   : > { %v4263_v15 = vpop.eup %3319  ;;  %3029 = vmatpush3.msra.mxu0 %v4032_v61 }
 0x2f4   : > { %v593_v40 = vmul.f32 1.442695, %v578_v34  ;;  %3030 = vmatprep.subr.mxu0 %v4743_v62  ;;  %2957 = vmatmul.mubr.msk.f32.gmra.mxu0 %vm544_vm4, %v4263_v15 }
 0x2f5   : > { %3031 = vmatpush3.msra.mxu0 %v4034_v3  ;;  %v568_v42 = vpop.xlane.xlu0 %567  ;;  %2959 = vmatprep.mubr.msk.f32.mxu0 %vm3468_vm0, %v4743_v62 }
 0x2f6   : > { %3327 = vpow2.f32 %v593_v40  ;;  %3032 = vmatprep.subr.mxu0 %v4743_v62  ;;  %v579_v23 = vsub.f32 %v4012_v28, %v568_v42 }
 0x2f7   : > { %v4274_v60 = vpop.eup %3321  ;;  %3033 = vmatpush3.msra.mxu0 %v4038_v8 }
 0x2f8   : > { %v595_v61 = vmul.f32 1.442695, %v579_v23  ;;  %3034 = vmatprep.subr.mxu0 %v4743_v62  ;;  %2960 = vmatmul.mubr.msk.f32.gmra.mxu0 %vm544_vm4, %v4274_v60 }
 0x2f9   : > { %3035 = vmatpush3.msra.mxu0 %v4090_v53  ;;  %v571_v3 = vpop.xlane.xlu0 %570  ;;  %2962 = vmatprep.mubr.msk.f32.mxu0 %vm3468_vm0, %v4743_v62 }
 0x2fa   : > { %3329 = vpow2.f32 %v595_v61  ;;  %3036 = vmatprep.subr.mxu0 %v4743_v62  ;;  %v580_v28 = vsub.f32 %v4018_v33, %v571_v3 }
 0x2fb   : > { %v4285_v51 = vpop.eup %3323  ;;  %3037 = vmatpush3.msra.mxu0 %v4106_v11 }
 0x2fc   : > { %v597_v8 = vmul.f32 1.442695, %v580_v28  ;;  %3038 = vmatprep.subr.mxu0 %v4743_v62  ;;  %2963 = vmatmul.mubr.msk.f32.gmra.mxu0 %vm544_vm4, %v4285_v51 }
 0x2fd   : > { %3039 = vmatpush3.msra.mxu0 %v4050_v22  ;;  %v1010_v53 = vpop.xlane.xlu1 %1009  ;;  %2965 = vmatprep.mubr.msk.f32.mxu0 %vm3468_vm0, %v4743_v62  ;;  %v1923_v22 = vmul.f32 0.35355338, %v4222_v46 }
 0x2fe   : > { %3331 = vpow2.f32 %v597_v8  ;;  %v1035_v32 = vsub.f32 %v4024_v38, %v1010_v53  ;;  %3112 = vmatprep.subr.mxu0 %v4743_v62  ;;  %v4310_v38 = vsel %vm351_vm3, %v1924_v12, -1e+30 }
 0x2ff   : > { %v4296_v33 = vpop.eup %3325  ;;  %v4316_v54 = vsel %vm351_vm3, %v1923_v22, -1e+30  ;;  %v1958_v46 = vsel %vm544_vm4, %v4310_v38, -inf }
 0x300   : > { %v1044_v11 = vmul.f32 1.442695, %v1035_v32  ;;  %2966 = vmatmul.mubr.msk.f32.gmra.mxu0 %vm544_vm4, %v4296_v33  ;;  %v1955_v20 = vsel %vm544_vm4, %v4316_v54, -inf }
 0x301   : > { %2968 = vmatprep.mubr.msk.f32.mxu0 %vm3468_vm0, %v4743_v62 }
 0x302   : > { %3333 = vpow2.f32 %v1044_v11 }
 0x303   : > { %v4304_v19 = vpop.eup %3327 }
 0x304   : > { %2969 = vmatmul.mubr.msk.f32.gmra.mxu0 %vm544_vm4, %v4304_v19 }
 0x305   : > { %2971 = vmatprep.mubr.msk.f32.mxu0 %vm3468_vm0, %v4743_v62 }
 0x307   : > { %v4318_v50 = vpop.eup %3329 }
 0x308   : > { %2972 = vmatmul.mubr.msk.f32.gmra.mxu0 %vm544_vm4, %v4318_v50 }
 0x309   : > { %1959 = vmax.xlane.f32.xlu1 %v1958_v46  ;;  %2974 = vmatprep.mubr.msk.f32.mxu0 %vm3468_vm0, %v4743_v62 }
 0x30a   : > { %1956 = vmax.xlane.f32.xlu0 %v1955_v20 }
 0x30b   : > { %v4328_v1 = vpop.eup %3331 }
 0x30c   : > { %2975 = vmatmul.mubr.msk.f32.gmra.mxu0 %vm544_vm4, %v4328_v1 }
 0x30d   : > { %3040 = vmatprep.mubr.msk.f32.mxu0 %vm3468_vm0, %v4743_v62 }
 0x30f   : > { %v3334_v48 = vpop.eup %3333 }
 0x310   : > { %3041 = vmatmul.mubr.msk.f32.vlgmr.msra.gmra.mxu0 %vm544_vm4, %v3334_v48  ;;  %v1062_v37 = vsel %vm544_vm4, %v3334_v48, 0.0 }
 0x311   : > { %3113 = vmatpush3.msra.mxu0 %v4131_v44  ;;  %1063 = vadd.xlane.f32.xlu0 %v1062_v37 }
 0x312   : > { %3114 = vmatprep.subr.mxu0 %v4743_v62  ;;  %3043 = vmatprep.mubr.msk.f32.mxu0 %vm3468_vm0, %v4743_v62 }
 0x313   : > { %3115 = vmatpush3.msra.mxu0 %v4074_v41  ;;  %v4356_v41 = vpop.permute.xlu0 %2028 }
 0x314   : > { %3116 = vmatprep.subr.mxu0 %v4743_v62 }
 0x315   : > { %3117 = vmatpush3.msra.mxu0 %v4100_v59  ;;  %v4358_v59 = vpop.permute.xlu1 %2030 }
 0x316   : > { %3118 = vmatprep.subr.mxu0 %v4743_v62 }
 0x317   : > { %3119 = vmatpush3.msra.mxu0 %v4120_v27 }
 0x318   : > { %3120 = vmatprep.subr.mxu0 %v4743_v62 }
 0x319   : > { %3121 = vmatpush3.msra.mxu0 %v4154_v13 }
 0x31a   : > { %3122 = vmatprep.subr.mxu0 %v4743_v62 }
 0x31b   : > { %3123 = vmatpush3.msra.mxu0 %v4141_v56 }
 0x31c   : > { %3124 = vmatprep.subr.mxu0 %v4743_v62 }
 0x31d   : > { %3125 = vmatpush3.msra.mxu0 %v4167_v35 }
 0x31e   : > { %3126 = vmatprep.subr.mxu0 %v4743_v62 }
 0x31f   : > { %3127 = vmatpush3.msra.mxu0 %v4188_v29 }
 0x320   : > { %3128 = vmatprep.subr.mxu0 %v4743_v62 }
 0x321   : > { %3129 = vmatpush3.msra.mxu0 %v4178_v58 }
 0x322   : > { %3202 = vmatprep.subr.mxu0 %v4743_v62 }
 0x32e   : > { %v1013_v27 = vpop.xlane.xlu0 %1012 }
 0x32f   : > { %v1036_v44 = vsub.f32 %v4044_v10, %v1013_v27 }
 0x331   : > { %v1046_v56 = vmul.f32 1.442695, %v1036_v44 }
 0x332   : > { %v1022_v13 = vpop.xlane.xlu1 %1021  ;;  %v1016_v35 = vpop.xlane.xlu0 %1015 }
 0x333   : > { %3335 = vpow2.f32 %v1046_v56  ;;  %v1037_v52 = vsub.f32 %v4054_v24, %v1016_v35  ;;  %v1039_v39 = vsub.f32 %v4058_v25, %v1022_v13 }
 0x335   : > { %v1048_v29 = vmul.f32 1.442695, %v1037_v52  ;;  %v1052_v34 = vmul.f32 1.442695, %v1039_v39 }
 0x336   : > { %v1028_v57 = vpop.xlane.xlu1 %1027  ;;  %v1019_v58 = vpop.xlane.xlu0 %1018 }
 0x337   : > { %v1041_v14 = vsub.f32 %v4072_v36, %v1028_v57  ;;  %v1038_v4 = vsub.f32 %v4064_v31, %v1019_v58  ;;  %3337 = vpow2.f32 %v1048_v29 }
 0x339   : > { %v1056_v16 = vmul.f32 1.442695, %v1041_v14  ;;  %v1050_v30 = vmul.f32 1.442695, %v1038_v4 }
 0x33a   : > { %v1034_v10 = vpop.xlane.xlu1 %1033  ;;  %v1025_v40 = vpop.xlane.xlu0 %1024 }
 0x33b   : > { %3339 = vpow2.f32 %v1056_v16  ;;  %v1040_v42 = vsub.f32 %v4084_v47, %v1025_v40  ;;  %v1043_v24 = vsub.f32 %v4088_v49, %v1034_v10 }
 0x33c   : > { %3341 = vpow2.f32 %v1050_v30 }
 0x33d   : > { %3343 = vpow2.f32 %v1052_v34  ;;  %v1054_v25 = vmul.f32 1.442695, %v1040_v42  ;;  %v1060_v8 = vmul.f32 1.442695, %v1043_v24 }
 0x33e   : > { %v4367_v23 = vpop.xlane.xlu1 %1487  ;;  %v1031_v61 = vpop.xlane.xlu0 %1030 }
 0x33f   : > { %v1042_v36 = vsub.f32 %v4094_v55, %v1031_v61  ;;  %3345 = vpow2.f32 %v1054_v25  ;;  %v1503_v14 = vsub.f32 %v4104_v0, %v4367_v23 }
 0x340   : > { %v3336_v31 = vpop.eup %3335 }
 0x341   : > { %v1058_v3 = vmul.f32 1.442695, %v1042_v36  ;;  %3044 = vmatmul.mubr.msk.f32.gmra.mxu0 %vm544_vm4, %v3336_v31  ;;  %v1065_v28 = vsel %vm544_vm4, %v3336_v31, 0.0  ;;  %v1517_v42 = vmul.f32 1.442695, %v1503_v14 }
 0x342   : > { %v4372_v53 = vpop.xlane.xlu1 %1493  ;;  %1066 = vadd.xlane.f32.xlu0 %v1065_v28  ;;  %v1473_v47 = vpop.xlane.xlu0 %1472  ;;  %3046 = vmatprep.mubr.msk.f32.mxu0 %vm3468_vm0, %v4743_v62 }
 0x343   : > { %v1498_v49 = vsub.f32 %v4114_v63, %v1473_v47  ;;  %3347 = vpow2.f32 %v1058_v3  ;;  %v1505_v36 = vsub.f32 %v4118_v21, %v4372_v53 }
 0x344   : > { %v3338_v32 = vpop.eup %3337  ;;  %3349 = vpow2.f32 %v1060_v8 }
 0x345   : > { %v1507_v55 = vmul.f32 1.442695, %v1498_v49  ;;  %3047 = vmatmul.mubr.msk.f32.gmra.mxu0 %vm544_vm4, %v3338_v32  ;;  %v1068_v11 = vsel %vm544_vm4, %v3338_v32, 0.0  ;;  %v1521_v53 = vmul.f32 1.442695, %v1505_v36  ;;  %v4744_v49 = vld [vmem:[#allocation6_spill] sm:$0xff] }
 0x346   : > { %v1476_v12 = vpop.xlane.xlu0 %1475  ;;  %v1936_v22 = vpop.xlane.xlu1 %1935  ;;  %1069 = vadd.xlane.f32.xlu0 %v1068_v11  ;;  %3049 = vmatprep.mubr.msk.f32.mxu0 %vm3468_vm0, %v4743_v62  ;;  %v4745_v11 = vld [vmem:[#allocation3_spill] sm:$0xff]  ;;  %v4753_v36 = vld [vmem:[#allocation10_spill] sm:$0xff] }
 0x347   : > { %v1499_v46 = vsub.f32 %v4128_v2, %v1476_v12  ;;  %3351 = vpow2.f32 %v1507_v55  ;;  %v1961_v24 = vsub.f32 %v4135_v45, %v1936_v22 }
 0x348   : > { %v3340_v20 = vpop.eup %3339 }
 0x349   : > { %v3342_v48 = vpop.eup %3341  ;;  %v1509_v63 = vmul.f32 1.442695, %v1499_v46  ;;  %v1080_v37 = vsel %vm544_vm4, %v3340_v20, 0.0  ;;  %v1970_v28 = vmul.f32 1.442695, %v1961_v24 }
 0x34a   : > { %3050 = vmatmul.mubr.msk.f32.gmra.mxu0 %vm544_vm4, %v3342_v48  ;;  %1081 = vadd.xlane.f32.xlu1 %v1080_v37  ;;  %v1071_v27 = vsel %vm544_vm4, %v3342_v48, 0.0  ;;  %v1479_v44 = vpop.xlane.xlu0 %1478  ;;  %v3344_v56 = vpop.eup %3343 }
 0x34b   : > { %1072 = vadd.xlane.f32.xlu0 %v1071_v27  ;;  %v1500_v13 = vsub.f32 %v4145_v6, %v1479_v44  ;;  %3052 = vmatprep.mubr.msk.f32.mxu0 %vm3468_vm0, %v4743_v62  ;;  %3353 = vpow2.f32 %v1509_v63  ;;  %v1939_v2 = vpop.xlane.xlu1 %1938  ;;  %v1074_v52 = vsel %vm544_vm4, %v3344_v56, 0.0  ;;  %v4746_v63 = vld [vmem:[#allocation4_spill] sm:$0xff]  ;;  %v4747_v44 = vld [vmem:[#allocation7_spill] sm:$0xff] }
 0x34c   : > { %v3346_v39 = vpop.eup %3345  ;;  %v1962_v8 = vsub.f32 %v4150_v5, %v1939_v2  ;;  %v4749_v2 = vld [vmem:[#allocation2_spill] sm:$0xff] }
 0x34d   : > { %v1511_v35 = vmul.f32 1.442695, %v1500_v13  ;;  %v1077_v4 = vsel %vm544_vm4, %v3346_v39, 0.0  ;;  %v4748_v13 = vld [vmem:[#allocation5_spill] sm:$0xff] }
 0x34e   : > { %3053 = vmatmul.mubr.msk.f32.gmra.mxu0 %vm544_vm4, %v3344_v56  ;;  %v1482_v29 = vpop.xlane.xlu0 %1481  ;;  %v1972_v55 = vmul.f32 1.442695, %v1962_v8 }
 0x34f   : > { %1075 = vadd.xlane.f32.xlu0 %v1074_v52  ;;  %v1501_v57 = vsub.f32 %v4160_v18, %v1482_v29  ;;  %3055 = vmatprep.mubr.msk.f32.mxu0 %vm3468_vm0, %v4743_v62  ;;  %3355 = vpow2.f32 %v1511_v35  ;;  %v4398_v10 = vpop.xlane.xlu1 %1941 }
 0x350   : > { %v3348_v6 = vpop.eup %3347  ;;  %v1963_v35 = vsub.f32 %v4749_v2, %v4398_v10 }
 0x351   : > { %v1513_v58 = vmul.f32 1.442695, %v1501_v57  ;;  %v1083_v16 = vsel %vm544_vm4, %v3348_v6, 0.0  ;;  %v3350_v34 = vpop.eup %3349  ;;  %v4750_v57 = vld [vmem:[#allocation9_spill] sm:$0xff] }
 0x352   : > { %3056 = vmatmul.mubr.msk.f32.gmra.mxu0 %vm544_vm4, %v3346_v39  ;;  %v1485_v30 = vpop.xlane.xlu0 %1484  ;;  %1084 = vadd.xlane.f32.xlu1 %v1083_v16  ;;  %v1086_v25 = vsel %vm544_vm4, %v3350_v34, 0.0 }
 0x353   : > { %1078 = vadd.xlane.f32.xlu0 %v1077_v4  ;;  %v1502_v18 = vsub.f32 %v4175_v17, %v1485_v30  ;;  %3357 = vpow2.f32 %v1513_v58  ;;  %3058 = vmatprep.mubr.msk.f32.mxu0 %vm3468_vm0, %v4743_v62  ;;  %v1945_v45 = vpop.xlane.xlu1 %1944  ;;  %v1974_v58 = vmul.f32 1.442695, %v1963_v35 }
 0x354   : > { %v3352_v40 = vpop.eup %3351  ;;  %v1964_v12 = vsub.f32 %v4745_v11, %v1945_v45 }
 0x355   : > { %v1515_v0 = vmul.f32 1.442695, %v1502_v18  ;;  %v1525_v23 = vsel %vm544_vm4, %v3352_v40, 0.0 }
 0x356   : > { %3059 = vmatmul.mubr.msk.f32.gmra.mxu0 %vm544_vm4, %v3340_v20  ;;  %v1491_v61 = vpop.xlane.xlu0 %1490  ;;  %1087 = vadd.xlane.f32.xlu1 %v1086_v25  ;;  %v1976_v48 = vmul.f32 1.442695, %v1964_v12 }
 0x357   : > { %1526 = vadd.xlane.f32.xlu0 %v1525_v23  ;;  %v1504_v17 = vsub.f32 %v4192_v43, %v1491_v61  ;;  %3359 = vpow2.f32 %v1515_v0  ;;  %3061 = vmatprep.mubr.msk.f32.mxu0 %vm3468_vm0, %v4743_v62  ;;  %v1948_v22 = vpop.xlane.xlu1 %1947  ;;  %v4752_v0 = vld [vmem:[#allocation8_spill] sm:$0xff] }
 0x358   : > { %v3354_v31 = vpop.eup %3353  ;;  %3361 = vpow2.f32 %v1517_v42  ;;  %v1965_v37 = vsub.f32 %v4746_v63, %v1948_v22 }
 0x359   : > { %v1519_v3 = vmul.f32 1.442695, %v1504_v17  ;;  %v1528_v47 = vsel %vm544_vm4, %v3354_v31, 0.0 }
 0x35a   : > { %3062 = vmatmul.mubr.msk.f32.gmra.mxu0 %vm544_vm4, %v3348_v6  ;;  %v1497_v21 = vpop.xlane.xlu0 %1496  ;;  %v1978_v52 = vmul.f32 1.442695, %v1965_v37 }
 0x35b   : > { %1529 = vadd.xlane.f32.xlu0 %v1528_v47  ;;  %v1506_v43 = vsub.f32 %v4744_v49, %v1497_v21  ;;  %3064 = vmatprep.mubr.msk.f32.mxu0 %vm3468_vm0, %v4743_v62  ;;  %3363 = vpow2.f32 %v1519_v3  ;;  %v611_v47 = vsel %vm544_vm4, %v4285_v51, 0.0  ;;  %v599_v49 = vsel %vm544_vm4, %v4241_v26, 0.0 }
 0x35c   : > { %v3356_v32 = vpop.eup %3355  ;;  %3365 = vpow2.f32 %v1970_v28  ;;  %v608_v26 = vsel %vm544_vm4, %v4274_v60, 0.0 }
 0x35d   : > { %v1531_v5 = vsel %vm544_vm4, %v3356_v32, 0.0  ;;  %3367 = vpow2.f32 %v1521_v53  ;;  %v1523_v46 = vmul.f32 1.442695, %v1506_v43  ;;  %v1954_v18 = vpop.xlane.xlu1 %1953  ;;  %v602_v43 = vsel %vm544_vm4, %v4252_v9, 0.0 }
 0x35e   : > { %3065 = vmatmul.mubr.msk.f32.gmra.mxu0 %vm544_vm4, %v3350_v34  ;;  %3369 = vpow2.f32 %v1972_v55  ;;  %v1951_v14 = vpop.xlane.xlu0 %1950  ;;  %v4751_v34 = vld [vmem:[#allocation11_spill] sm:$0xff]  ;;  %v1967_v17 = vsub.f32 %v4753_v36, %v1954_v18  ;;  %v614_v9 = vsel %vm544_vm4, %v4296_v33, 0.0  ;;  %v620_v33 = vsel %vm544_vm4, %v4318_v50, 0.0 }
 0x35f   : > { %1532 = vadd.xlane.f32.xlu0 %v1531_v5  ;;  %3130 = vmatprep.mubr.msk.f32.mxu0 %vm3468_vm0, %v4743_v62  ;;  %3371 = vpow2.f32 %v1523_v46  ;;  %v1966_v42 = vsub.f32 %v4752_v0, %v1951_v14 }
 0x360   : > { %v3358_v20 = vpop.eup %3357  ;;  %3373 = vpow2.f32 %v1976_v48  ;;  %v1982_v8 = vmul.f32 1.442695, %v1967_v17 }
 0x361   : > { %v1534_v27 = vsel %vm544_vm4, %v3358_v20, 0.0  ;;  %3375 = vpow2.f32 %v1978_v52  ;;  %v2025_v23 = vpop.permute.xlu1 %2024 }
 0x362   : > { %3131 = vmatmul.mubr.msk.f32.vlgmr.msra.gmra.mxu0 %vm544_vm4, %v3352_v40  ;;  %3377 = vpow2.f32 %v1974_v58  ;;  %v2027_v25 = vpop.permute.xlu0 %2026 }
 0x363   : > { %3203 = vmatpush3.msra.mxu0 %v4747_v44  ;;  %1535 = vadd.xlane.f32.xlu0 %v1534_v27 }
 0x364   : > { %3204 = vmatprep.subr.mxu0 %v4743_v62  ;;  %3133 = vmatprep.mubr.msk.f32.mxu0 %vm3468_vm0, %v4743_v62  ;;  %v3360_v56 = vpop.eup %3359 }
 0x365   : > { %3205 = vmatpush3.msra.mxu0 %v4748_v13  ;;  %v1537_v29 = vsel %vm544_vm4, %v3360_v56, 0.0  ;;  %v3362_v39 = vpop.eup %3361 }
 0x366   : > { %3206 = vmatprep.subr.mxu0 %v4743_v62  ;;  %3134 = vmatmul.mubr.msk.f32.gmra.mxu0 %vm544_vm4, %v3354_v31  ;;  %v1540_v4 = vsel %vm544_vm4, %v3362_v39, 0.0  ;;  %v1980_v31 = vmul.f32 1.442695, %v1966_v42 }
 0x367   : > { %3207 = vmatpush3.msra.mxu0 %v4750_v57  ;;  %1538 = vadd.xlane.f32.xlu0 %v1537_v29 }
 0x368   : > { %3208 = vmatprep.subr.mxu0 %v4743_v62  ;;  %3136 = vmatprep.mubr.msk.f32.mxu0 %vm3468_vm0, %v4743_v62  ;;  %v3364_v6 = vpop.eup %3363  ;;  %3379 = vpow2.f32 %v1980_v31 }
 0x369   : > { %3209 = vmatpush3.msra.mxu0 %v4232_v7  ;;  %v1543_v16 = vsel %vm544_vm4, %v3364_v6, 0.0  ;;  %v4445_v30 = vpop.eup %3365  ;;  %3381 = vpow2.f32 %v1982_v8 }
 0x36a   : > { %3210 = vmatprep.subr.mxu0 %v4743_v62  ;;  %3137 = vmatmul.mubr.msk.f32.gmra.mxu0 %vm544_vm4, %v3356_v32  ;;  %v3368_v10 = vpop.eup %3367  ;;  %v1988_v7 = vsel %vm544_vm4, %v4445_v30, 0.0  ;;  %v605_v32 = vsel %vm544_vm4, %v4263_v15, 0.0  ;;  %v617_v15 = vsel %vm544_vm4, %v4304_v19, 0.0  ;;  %v623_v19 = vsel %vm544_vm4, %v4328_v1, 0.0 }
 0x36b   : > { %3211 = vmatpush3.msra.mxu0 %v4751_v34  ;;  %1541 = vadd.xlane.f32.xlu0 %v1540_v4  ;;  %v3370_v40 = vpop.eup %3369  ;;  %v1546_v24 = vsel %vm544_vm4, %v3368_v10, 0.0 }
 0x36c   : > { %3212 = vmatprep.subr.mxu0 %v4743_v62  ;;  %1544 = vadd.xlane.f32.xlu1 %v1543_v16  ;;  %v1991_v61 = vsel %vm544_vm4, %v3370_v40, 0.0 }
 0x36d   : > { %3213 = vmatpush3.msra.mxu0 %v4358_v59  ;;  %3139 = vmatprep.mubr.msk.f32.mxu0 %vm3468_vm0, %v4743_v62  ;;  %v3372_v59 = vpop.eup %3371 }
 0x36e   : > { %3214 = vmatprep.subr.mxu0 %v4743_v62  ;;  %3140 = vmatmul.mubr.msk.f32.gmra.mxu0 %vm544_vm4, %v3358_v20  ;;  %v1549_v45 = vsel %vm544_vm4, %v3372_v59, 0.0 }
 0x36f   : > { %3215 = vmatpush3.msra.mxu0 %v4356_v41  ;;  %1989 = vadd.xlane.f32.xlu0 %v1988_v7  ;;  %v3374_v41 = vpop.eup %3373 }
 0x370   : > { %3216 = vmatprep.subr.mxu0 %v4743_v62  ;;  %1547 = vadd.xlane.f32.xlu1 %v1546_v24  ;;  %v1997_v3 = vsel %vm544_vm4, %v3374_v41, 0.0  ;;  %v3376_v28 = vpop.eup %3375 }
 0x371   : > { %3217 = vmatpush3.msra.mxu0 %v2027_v25  ;;  %3142 = vmatprep.mubr.msk.f32.mxu0 %vm3468_vm0, %v4743_v62  ;;  %v2000_v21 = vsel %vm544_vm4, %v3376_v28, 0.0  ;;  %v3378_v53 = vpop.eup %3377 }
 0x372   : > { %3218 = vmatprep.subr.mxu0 %v4743_v62  ;;  %3143 = vmatmul.mubr.msk.f32.gmra.mxu0 %vm544_vm4, %v3360_v56  ;;  %v1994_v51 = vsel %vm544_vm4, %v3378_v53, 0.0 }
 0x373   : > { %3219 = vmatpush3.msra.mxu0 %v2025_v23  ;;  %1992 = vadd.xlane.f32.xlu0 %v1991_v61 }
 0x374   : > { %1550 = vadd.xlane.f32.xlu1 %v1549_v45  ;;  %3145 = vmatprep.mubr.msk.f32.mxu0 %vm3468_vm0, %v4743_v62 }
 0x375   : > { %3247 = vmatprep.subr.mxu0 %v4743_v62  ;;  %v3380_v55 = vpop.eup %3379 }
 0x376   : > { %3146 = vmatmul.mubr.msk.f32.gmra.mxu0 %vm544_vm4, %v3362_v39  ;;  %v2003_v11 = vsel %vm544_vm4, %v3380_v55, 0.0  ;;  %v3382_v60 = vpop.eup %3381 }
 0x377   : > { %1998 = vadd.xlane.f32.xlu0 %v1997_v3  ;;  %3148 = vmatprep.mubr.msk.f32.mxu0 %vm3468_vm0, %v4743_v62  ;;  %v2006_v12 = vsel %vm544_vm4, %v3382_v60, 0.0 }
 0x378   : > { %612 = vadd.xlane.f32.xlu1 %v611_v47 }
 0x37a   : > { %3149 = vmatmul.mubr.msk.f32.gmra.mxu0 %vm544_vm4, %v3364_v6 }
 0x37b   : > { %2001 = vadd.xlane.f32.xlu0 %v2000_v21  ;;  %3151 = vmatprep.mubr.msk.f32.mxu0 %vm3468_vm0, %v4743_v62 }
 0x37c   : > { %600 = vadd.xlane.f32.xlu1 %v599_v49 }
 0x37e   : > { %3152 = vmatmul.mubr.msk.f32.gmra.mxu0 %vm544_vm4, %v3368_v10 }
 0x37f   : > { %1995 = vadd.xlane.f32.xlu0 %v1994_v51  ;;  %3154 = vmatprep.mubr.msk.f32.mxu0 %vm3468_vm0, %v4743_v62 }
 0x380   : > { %603 = vadd.xlane.f32.xlu1 %v602_v43 }
 0x382   : > { %3155 = vmatmul.mubr.msk.f32.gmra.mxu0 %vm544_vm4, %v3372_v59 }
 0x383   : > { %609 = vadd.xlane.f32.xlu0 %v608_v26  ;;  %3220 = vmatprep.mubr.msk.f32.mxu0 %vm3468_vm0, %v4743_v62 }
 0x384   : > { %606 = vadd.xlane.f32.xlu1 %v605_v32 }
 0x386   : > { %3221 = vmatmul.mubr.msk.f32.vlgmr.msra.gmra.mxu0 %vm544_vm4, %v4445_v30 }
 0x387   : > { %615 = vadd.xlane.f32.xlu0 %v614_v9  ;;  %3223 = vmatprep.mubr.msk.f32.mxu0 %vm3468_vm0, %v4743_v62 }
 0x388   : > { %2004 = vadd.xlane.f32.xlu1 %v2003_v11 }
 0x38a   : > { %3224 = vmatmul.mubr.msk.f32.gmra.mxu0 %vm544_vm4, %v3370_v40 }
 0x38b   : > { %618 = vadd.xlane.f32.xlu0 %v617_v15  ;;  %3226 = vmatprep.mubr.msk.f32.mxu0 %vm3468_vm0, %v4743_v62 }
 0x38c   : > { %2007 = vadd.xlane.f32.xlu1 %v2006_v12 }
 0x38e   : > { %3227 = vmatmul.mubr.msk.f32.gmra.mxu0 %vm544_vm4, %v3378_v53 }
 0x38f   : > { %621 = vadd.xlane.f32.xlu0 %v620_v33  ;;  %3229 = vmatprep.mubr.msk.f32.mxu0 %vm3468_vm0, %v4743_v62 }
 0x392   : > { %3230 = vmatmul.mubr.msk.f32.gmra.mxu0 %vm544_vm4, %v3374_v41  ;;  %v1960_v5 = vpop.xlane.xlu1 %1959 }
 0x393   : > { %v1969_v22 = vsub.f32 %v4310_v38, %v1960_v5  ;;  %624 = vadd.xlane.f32.xlu0 %v623_v19  ;;  %v1957_v46 = vpop.xlane.xlu0 %1956  ;;  %3232 = vmatprep.mubr.msk.f32.mxu0 %vm3468_vm0, %v4743_v62 }
 0x394   : > { %v1968_v20 = vsub.f32 %v4316_v54, %v1957_v46 }
 0x395   : > { %v1986_v50 = vmul.f32 1.442695, %v1969_v22 }
 0x396   : > { %v1984_v48 = vmul.f32 1.442695, %v1968_v20  ;;  %3233 = vmatmul.mubr.msk.f32.gmra.mxu0 %vm544_vm4, %v3376_v28 }
 0x397   : > { %3235 = vmatprep.mubr.msk.f32.mxu0 %vm3468_vm0, %v4743_v62 }
 0x398   : > { %3383 = vpow2.f32 %v1984_v48 }
 0x399   : > { %3385 = vpow2.f32 %v1986_v50 }
 0x39a   : > { %3236 = vmatmul.mubr.msk.f32.gmra.mxu0 %vm544_vm4, %v3380_v55  ;;  %v1064_v57 = vpop.xlane.xlu0 %1063 }
 0x39b   : > { %3238 = vmatprep.mubr.msk.f32.mxu0 %vm3468_vm0, %v4743_v62  ;;  %3387 = vrcp.f32 %v1064_v57 }
 0x39e   : > { %3239 = vmatmul.mubr.msk.f32.gmra.mxu0 %vm544_vm4, %v3382_v60 }
 0x39f   : > { %3241 = vmatprep.mubr.msk.f32.mxu0 %vm3468_vm0, %v4743_v62 }
 0x3a5   : > { %v3384_v38 = vpop.eup %3383 }
 0x3a6   : > { %3242 = vmatmul.mubr.msk.f32.gmra.mxu0 %vm544_vm4, %v3384_v38  ;;  %v2009_v54 = vsel %vm544_vm4, %v3384_v38, 0.0  ;;  %v3386_v1 = vpop.eup %3385 }
 0x3a7   : > { %2010 = vadd.xlane.f32.xlu1 %v2009_v54  ;;  %3244 = vmatprep.mubr.msk.f32.mxu0 %vm3468_vm0, %v4743_v62  ;;  %v2012_v63 = vsel %vm544_vm4, %v3386_v1, 0.0 }
 0x3a8   : > { %v3388_v18 = vpop.eup %3387 }
 0x3aa   : > { %3245 = vmatmul.mubr.msk.f32.gmra.mxu0 %vm544_vm4, %v3386_v1 }
 0x3ab   : > { %2013 = vadd.xlane.f32.xlu1 %v2012_v63  ;;  %3255 = vmatprep.mubr.msk.f32.mxu0 %vm3468_vm0, %v4743_v62 }
 0x3ac   : > { %v4537_v37 = vpop.f32.mrf.mxu0 }
 0x3ae   : > { %v2952_v27 = vpop.f32.mrf.mxu0 }
 0x3b0   : > { %v4539_v44 = vpop.f32.mrf.mxu0 }
 0x3b2   : > { %v2955_v56 = vpop.f32.mrf.mxu0 }
 0x3b4   : > { %v4541_v13 = vpop.f32.mrf.mxu0 }
 0x3b6   : > { %v2958_v2 = vpop.f32.mrf.mxu0 }
 0x3b8   : > { %v4543_v35 = vpop.f32.mrf.mxu0 }
 0x3ba   : > { %v2961_v52 = vpop.f32.mrf.mxu0 }
 0x3bc   : > { %v4545_v29 = vpop.f32.mrf.mxu0 }
 0x3be   : > { %v2964_v39 = vpop.f32.mrf.mxu0 }
 0x3c0   : > { %v4547_v6 = vpop.f32.mrf.mxu0 }
 0x3c2   : > { %v2967_v58 = vpop.f32.mrf.mxu0 }
 0x3c4   : > { %v4549_v14 = vpop.f32.mrf.mxu0 }
 0x3c6   : > { %v2970_v4 = vpop.f32.mrf.mxu0 }
 0x3c8   : > { %v4551_v16 = vpop.f32.mrf.mxu0 }
 0x3ca   : > { %v2973_v30 = vpop.f32.mrf.mxu0 }
 0x3cb   : > { %v1067_v42 = vpop.xlane.xlu0 %1066 }
 0x3cc   : > { %v4553_v34 = vpop.f32.mrf.mxu0  ;;  %3389 = vrcp.f32 %v1067_v42  ;;  %v2337_v42 = vld [vmem:[%s4722_s2 + $0x18] sm:$0xff] }
 0x3cd   : > { %3286 = vmatpush3.msra.mxu1 %v2337_v42  ;;  %3248 = vmatpush3.msra.mxu0 %v2337_v42 }
 0x3ce   : > { %v2976_v10 = vpop.f32.mrf.mxu0  ;;  %3283 = vmatprep.subr.mxu1 %v4743_v62  ;;  %3249 = vmatprep.subr.mxu0 %v4743_v62 }
 0x3cf   : > { %v1070_v24 = vpop.xlane.xlu0 %1069 }
 0x3d0   : > { %v1218_v7 = vpop.f32.mrf.mxu0  ;;  %3391 = vrcp.f32 %v1070_v24 }
 0x3d1   : > { %v1262_v40 = vmul.f32 %v3388_v18, %v1218_v7 }
 0x3d2   : > { %v3042_v0 = vpop.f32.mrf.mxu0 }
 0x3d3   : > { %2206 = vrot.lane.b32.xlu1 %v1262_v40, %s3480_s14  ;;  %v1082_v45 = vpop.xlane.xlu1 %1081 }
 0x3d4   : > { %v1073_v59 = vpop.xlane.xlu0 %1072 }
 0x3d5   : > { %3393 = vrcp.f32 %v1073_v59 }
 0x3d8   : > { %v1076_v25 = vpop.xlane.xlu0 %1075 }
 0x3d9   : > { %v3390_v23 = vpop.eup %3389  ;;  %3395 = vrcp.f32 %v1076_v25 }
 0x3db   : > { %v1085_v53 = vpop.xlane.xlu1 %1084 }
 0x3dc   : > { %v1079_v41 = vpop.xlane.xlu0 %1078 }
 0x3dd   : > { %3397 = vrcp.f32 %v1079_v41  ;;  %v3392_v31 = vpop.eup %3391 }
 0x3de   : > { %3399 = vrcp.f32 %v1082_v45 }
 0x3df   : > { %3401 = vrcp.f32 %v1085_v53  ;;  %v1088_v50 = vpop.xlane.xlu1 %1087 }
 0x3e0   : > { %v1527_v8 = vpop.xlane.xlu0 %1526 }
 0x3e1   : > { %3403 = vrcp.f32 %v1527_v8 }
 0x3e2   : > { %v3394_v21 = vpop.eup %3393 }
 0x3e4   : > { %v1530_v32 = vpop.xlane.xlu0 %1529 }
 0x3e5   : > { %3405 = vrcp.f32 %v1530_v32  ;;  %v2335_v32 = vld [vmem:[%s4722_s2 + $0x8] sm:$0xff] }
 0x3e6   : > { %v3396_v26 = vpop.eup %3395 }
 0x3e8   : > { %v4561_v33 = vpop.xlane.xlu0 %1532 }
 0x3ea   : > { %v3398_v60 = vpop.eup %3397 }
 0x3eb   : > { %v3400_v19 = vpop.eup %3399 }
 0x3ec   : > { %v3402_v48 = vpop.eup %3401  ;;  %v1536_v38 = vpop.xlane.xlu0 %1535 }
 0x3ed   : > { %3407 = vrcp.f32 %v1536_v38 }
 0x3ee   : > { %v3404_v39 = vpop.eup %3403 }
 0x3f0   : > { %v1539_v2 = vpop.xlane.xlu0 %1538 }
 0x3f1   : > { %3409 = vrcp.f32 %v1539_v2 }
 0x3f2   : > { %v3406_v10 = vpop.eup %3405 }
 0x3f4   : > { %v1542_v18 = vpop.xlane.xlu0 %1541 }
 0x3f5   : > { %v1545_v27 = vpop.xlane.xlu1 %1544  ;;  %3411 = vrcp.f32 %v1542_v18 }
 0x3f6   : > { %3413 = vrcp.f32 %v1545_v27 }
 0x3f9   : > { %v1548_v4 = vpop.xlane.xlu1 %1547 }
 0x3fa   : > { %3415 = vrcp.f32 %v1548_v4 }
 0x3fb   : > { %3417 = vrcp.f32 %v1088_v50 }
 0x3fd   : > { %v1551_v24 = vpop.xlane.xlu1 %1550 }
 0x401   : > { %v1223_v61 = vpop.f32.mrf.mxu0 }
 0x402   : > { %v1263_v36 = vmul.f32 %v3390_v23, %v1223_v61  ;;  %v3408_v23 = vpop.eup %3407 }
 0x403   : > { %v3045_v17 = vpop.f32.mrf.mxu0  ;;  %v3410_v45 = vpop.eup %3409 }
 0x404   : > { %2208 = vrot.lane.b32.xlu1 %v1263_v36, %s3480_s14  ;;  %v4577_v36 = vpop.xlane.xlu1 %612  ;;  %v3412_v53 = vpop.eup %3411 }
 0x405   : > { %v1228_v3 = vpop.f32.mrf.mxu0 }
 0x406   : > { %v4557_v28 = vmul.f32 %v3392_v31, %v1228_v3  ;;  %v2336_v31 = vld [vmem:[%s4722_s2 + $0x10] sm:$0xff] }
 0x407   : > { %v3048_v47 = vpop.f32.mrf.mxu0  ;;  %3287 = vmatpush3.msra.mxu1 %v2336_v31  ;;  %3250 = vmatpush3.msra.mxu0 %v2336_v31 }
 0x408   : > { %3284 = vmatprep.subr.mxu1 %v4743_v62  ;;  %3251 = vmatprep.subr.mxu0 %v4743_v62  ;;  %v1990_v47 = vpop.xlane.xlu0 %1989 }
 0x409   : > { %3419 = vrcp.f32 %v1990_v47  ;;  %3252 = vmatpush3.msra.mxu0 %v2335_v32  ;;  %3288 = vmatpush3.msra.mxu1 %v2335_v32 }
 0x40a   : > { %v1233_v49 = vpop.f32.mrf.mxu0  ;;  %3421 = vrcp.f32 %v1551_v24  ;;  %3253 = vmatprep.subr.mxu0 %v4743_v62  ;;  %3285 = vmatprep.subr.mxu1 %v4743_v62 }
 0x40b   : > { %v1265_v51 = vmul.f32 %v3394_v21, %v1233_v49  ;;  %v4586_v49 = vpop.xlane.xlu1 %600 }
 0x40c   : > { %v3051_v43 = vpop.f32.mrf.mxu0 }
 0x40d   : > { %2212 = vrot.lane.b32.xlu1 %v1265_v51, %s3480_s14 }
 0x40e   : > { %v1238_v55 = vpop.f32.mrf.mxu0 }
 0x40f   : > { %v1266_v9 = vmul.f32 %v3396_v26, %v1238_v55  ;;  %v3414_v55 = vpop.eup %3413 }
 0x410   : > { %v3054_v11 = vpop.f32.mrf.mxu0 }
 0x411   : > { %2214 = vrot.lane.b32.xlu1 %v1266_v9, %s3480_s14  ;;  %v1993_v9 = vpop.xlane.xlu0 %1992 }
 0x412   : > { %v1243_v15 = vpop.f32.mrf.mxu0 }
 0x413   : > { %v1267_v12 = vmul.f32 %v3398_v60, %v1243_v15  ;;  %v4594_v15 = vpop.xlane.xlu1 %603 }
 0x414   : > { %v3057_v5 = vpop.f32.mrf.mxu0 }
 0x415   : > { %2216 = vrot.lane.b32.xlu0 %v1267_v12, %s3480_s14  ;;  %v2334_v5 = vld [vmem:[%s4722_s2] sm:$0xff] }
 0x416   : > { %v1248_v22 = vpop.f32.mrf.mxu0  ;;  %3254 = vmatpush3.msra.mxu0 %v2334_v5  ;;  %3289 = vmatpush3.msra.mxu1 %v2334_v5 }
 0x417   : > { %v1268_v46 = vmul.f32 %v3400_v19, %v1248_v22  ;;  %v3416_v19 = vpop.eup %3415  ;;  %v4601_v38 = vpop.xlane.xlu1 %606 }
 0x418   : > { %v3060_v20 = vpop.f32.mrf.mxu0 }
 0x419   : > { %2218 = vrot.lane.b32.xlu0 %v1268_v46, %s3480_s14  ;;  %v1999_v20 = vpop.xlane.xlu0 %1998 }
 0x41a   : > { %v1253_v54 = vpop.f32.mrf.mxu0  ;;  %3423 = vrcp.f32 %v1999_v20 }
 0x41b   : > { %v1269_v1 = vmul.f32 %v3402_v48, %v1253_v54  ;;  %v3418_v48 = vpop.eup %3417  ;;  %v2005_v4 = vpop.xlane.xlu1 %2004 }
 0x41c   : > { %v3063_v63 = vpop.f32.mrf.mxu0  ;;  %v3420_v27 = vpop.eup %3419 }
 0x41d   : > { %2220 = vrot.lane.b32.xlu0 %v1269_v1, %s3480_s14  ;;  %v3422_v2 = vpop.eup %3421 }
 0x41e   : > { %v4566_v56 = vpop.f32.mrf.mxu0 }
 0x41f   : > { %v1270_v1 = vmul.f32 %v3418_v48, %v4566_v56  ;;  %v2008_v18 = vpop.xlane.xlu1 %2007 }
 0x420   : > { %v3066_v52 = vpop.f32.mrf.mxu0 }
 0x421   : > { %v2002_v52 = vpop.xlane.xlu0 %2001 }
 0x422   : > { %v1681_v57 = vpop.f32.mrf.mxu0  ;;  %3425 = vrcp.f32 %v2002_v52 }
 0x423   : > { %v1725_v58 = vmul.f32 %v3404_v39, %v1681_v57  ;;  %3427 = vrcp.f32 %v1993_v9 }
 0x424   : > { %v3132_v30 = vpop.f32.mrf.mxu0  ;;  %3429 = vrcp.f32 %v2005_v4 }
 0x425   : > { %2242 = vrot.lane.b32.xlu1 %v1725_v58, %s3481_s17  ;;  %3431 = vrcp.f32 %v2008_v18 }
 0x426   : > { %v1686_v7 = vpop.f32.mrf.mxu0  ;;  %3433 = vrcp.f32 %v4561_v33 }
 0x427   : > { %v1726_v40 = vmul.f32 %v3406_v10, %v1686_v7 }
 0x428   : > { %v3135_v0 = vpop.f32.mrf.mxu0 }
 0x429   : > { %2244 = vrot.lane.b32.xlu1 %v1726_v40, %s3481_s17  ;;  %v3424_v0 = vpop.eup %3423 }
 0x42a   : > { %v4573_v59 = vpop.f32.mrf.mxu0 }
 0x42c   : > { %v3138_v25 = vpop.f32.mrf.mxu0 }
 0x42e   : > { %v1696_v61 = vpop.f32.mrf.mxu0 }
 0x42f   : > { %v1728_v41 = vmul.f32 %v3408_v23, %v1696_v61  ;;  %v1996_v61 = vpop.xlane.xlu0 %1995 }
 0x430   : > { %v3141_v17 = vpop.f32.mrf.mxu0  ;;  %v2011_v25 = vpop.xlane.xlu1 %2010  ;;  %3435 = vrcp.f32 %v1996_v61 }
 0x431   : > { %2248 = vrot.lane.b32.xlu0 %v1728_v41, %s3481_s17  ;;  %v3426_v41 = vpop.eup %3425  ;;  %3437 = vrcp.f32 %v2011_v25 }
 0x432   : > { %v1701_v3 = vpop.f32.mrf.mxu0 }
 0x433   : > { %v1729_v8 = vmul.f32 %v3410_v45, %v1701_v3  ;;  %v3428_v3 = vpop.eup %3427 }
 0x434   : > { %v3144_v21 = vpop.f32.mrf.mxu0  ;;  %v2014_v47 = vpop.xlane.xlu1 %2013 }
 0x435   : > { %2250 = vrot.lane.b32.xlu0 %v1729_v8, %s3481_s17  ;;  %v3430_v8 = vpop.eup %3429  ;;  %3439 = vrcp.f32 %v2014_v47 }
 0x436   : > { %v1706_v51 = vpop.f32.mrf.mxu0  ;;  %v3432_v33 = vpop.eup %3431  ;;  %3441 = vrcp.f32 %v4586_v49 }
 0x437   : > { %v1730_v43 = vmul.f32 %v3412_v53, %v1706_v51  ;;  %v3434_v9 = vpop.eup %3433 }
 0x438   : > { %v3147_v26 = vpop.f32.mrf.mxu0 }
 0x439   : > { %2252 = vrot.lane.b32.xlu1 %v1730_v43, %s3481_s17 }
 0x43a   : > { %v1711_v11 = vpop.f32.mrf.mxu0 }
 0x43b   : > { %v1731_v60 = vmul.f32 %v3414_v55, %v1711_v11  ;;  %v1727_v11 = vmul.f32 %v3434_v9, %v4573_v59 }
 0x43c   : > { %v3150_v12 = vpop.f32.mrf.mxu0 }
 0x43d   : > { %2254 = vrot.lane.b32.xlu0 %v1731_v60, %s3481_s17  ;;  %v3436_v60 = vpop.eup %3435 }
 0x43e   : > { %v1716_v22 = vpop.f32.mrf.mxu0  ;;  %v3438_v12 = vpop.eup %3437 }
 0x43f   : > { %v1732_v46 = vmul.f32 %v3416_v19, %v1716_v22 }
 0x440   : > { %v3153_v50 = vpop.f32.mrf.mxu0 }
 0x441   : > { %2256 = vrot.lane.b32.xlu0 %v1732_v46, %s3481_s17 }
 0x442   : > { %v1721_v54 = vpop.f32.mrf.mxu0  ;;  %v3440_v20 = vpop.eup %3439 }
 0x443   : > { %v1733_v57 = vmul.f32 %v3422_v2, %v1721_v54  ;;  %v610_v54 = vpop.xlane.xlu0 %609 }
 0x444   : > { %v3156_v63 = vpop.f32.mrf.mxu0  ;;  %3443 = vrcp.f32 %v610_v54 }
 0x445   : > { %2222 = vrot.lane.b32.xlu0 %v1270_v1, %s3480_s14  ;;  %v2207_v2 = vpop.permute.xlu1 %2206  ;;  %3445 = vrcp.f32 %v4577_v36 }
 0x446   : > { %v2144_v39 = vpop.f32.mrf.mxu0  ;;  %3447 = vrcp.f32 %v4594_v15 }
 0x447   : > { %v2188_v58 = vmul.f32 %v3420_v27, %v2144_v39  ;;  %v616_v59 = vpop.xlane.xlu0 %615 }
 0x448   : > { %v3222_v30 = vpop.f32.mrf.mxu0  ;;  %3449 = vrcp.f32 %v616_v59 }
 0x449   : > { %2258 = vrot.lane.b32.xlu0 %v1733_v57, %s3481_s17  ;;  %2278 = vrot.lane.b32.xlu1 %v2188_v58, %s3482_s27 }
 0x44a   : > { %v2149_v10 = vpop.f32.mrf.mxu0 }
 0x44b   : > { %v2189_v53 = vmul.f32 %v3428_v3, %v2149_v10  ;;  %v619_v1 = vpop.xlane.xlu0 %618 }
 0x44c   : > { %v3225_v56 = vpop.f32.mrf.mxu0  ;;  %3451 = vrcp.f32 %v619_v1 }
 0x44d   : > { %3453 = vrcp.f32 %v4601_v38 }
 0x44e   : > { %v2154_v7 = vpop.f32.mrf.mxu0 }
 0x44f   : > { %v2190_v19 = vmul.f32 %v3436_v60, %v2154_v7  ;;  %v622_v63 = vpop.xlane.xlu0 %621  ;;  %v3442_v7 = vpop.eup %3441 }
 0x450   : > { %v3228_v40 = vpop.f32.mrf.mxu0  ;;  %3455 = vrcp.f32 %v622_v63 }
 0x452   : > { %v2159_v42 = vpop.f32.mrf.mxu0 }
 0x453   : > { %v2191_v24 = vmul.f32 %v3424_v0, %v2159_v42  ;;  %v625_v27 = vpop.xlane.xlu0 %624  ;;  %v799_v42 = vmul.f32 %v3442_v7, %v4537_v37  ;;  %v3444_v37 = vpop.eup %3443 }
 0x454   : > { %v3231_v23 = vpop.f32.mrf.mxu0  ;;  %3457 = vrcp.f32 %v625_v27 }
 0x455   : > { %2284 = vrot.lane.b32.xlu1 %v2191_v24, %s3482_s27  ;;  %v2305_v25 = vsel %vm379_vm2, %v799_v42, %v2207_v2 }
 0x456   : > { %v2164_v17 = vpop.f32.mrf.mxu0 }
 0x457   : > { %v2192_v31 = vmul.f32 %v3426_v41, %v2164_v17  ;;  %v802_v41 = vmul.f32 %v3444_v37, %v4543_v35  ;;  %v3446_v17 = vpop.eup %3445 }
 0x458   : > { %v3234_v45 = vpop.f32.mrf.mxu0  ;;  %v803_v47 = vmul.f32 %v3446_v17, %v4545_v29 }
 0x459   : > { %2286 = vrot.lane.b32.xlu1 %v2192_v31, %s3482_s27 }
 0x45a   : > { %v2169_v21 = vpop.f32.mrf.mxu0 }
 0x45b   : > { %v2193_v51 = vmul.f32 %v3430_v8, %v2169_v21  ;;  %v3448_v8 = vpop.eup %3447 }
 0x45c   : > { %v3237_v43 = vpop.f32.mrf.mxu0 }
 0x45d   : > { %2280 = vrot.lane.b32.xlu1 %v2189_v53, %s3482_s27  ;;  %2288 = vrot.lane.b32.xlu0 %v2193_v51, %s3482_s27  ;;  %v3450_v53 = vpop.eup %3449 }
 0x45e   : > { %v2174_v26 = vpop.f32.mrf.mxu0 }
 0x45f   : > { %v2194_v32 = vmul.f32 %v3432_v33, %v2174_v26  ;;  %v800_v33 = vmul.f32 %v3448_v8, %v4539_v44  ;;  %v804_v26 = vmul.f32 %v3450_v53, %v4547_v6 }
 0x460   : > { %v3240_v55 = vpop.f32.mrf.mxu0 }
 0x461   : > { %2210 = vrot.lane.b32.xlu1 %v4557_v28, %s3480_s14  ;;  %2290 = vrot.lane.b32.xlu0 %v2194_v32, %s3482_s27  ;;  %v3452_v32 = vpop.eup %3451 }
 0x462   : > { %v805_v6 = vmul.f32 %v3452_v32, %v4549_v14 }
 0x465   : > { %2246 = vrot.lane.b32.xlu1 %v1727_v11, %s3481_s17 }
 0x466   : > { %v2179_v5 = vpop.f32.mrf.mxu0 }
 0x467   : > { %v2195_v22 = vmul.f32 %v3438_v12, %v2179_v5 }
 0x468   : > { %v3243_v46 = vpop.f32.mrf.mxu0 }
 0x469   : > { %2282 = vrot.lane.b32.xlu1 %v2190_v19, %s3482_s27  ;;  %2292 = vrot.lane.b32.xlu0 %v2195_v22, %s3482_s27 }
 0x46a   : > { %v2184_v50 = vpop.f32.mrf.mxu0 }
 0x46b   : > { %v2196_v28 = vmul.f32 %v3440_v20, %v2184_v50  ;;  %v3454_v50 = vpop.eup %3453 }
 0x46c   : > { %v3246_v48 = vpop.f32.mrf.mxu0  ;;  %v801_v1 = vmul.f32 %v3454_v50, %v4541_v13 }
 0x46d   : > { %2294 = vrot.lane.b32.xlu0 %v2196_v28, %s3482_s27  ;;  %v3456_v48 = vpop.eup %3455 }
 0x46e   : > { %v806_v59 = vmul.f32 %v3456_v48, %v4551_v16  ;;  %v3458_v63 = vpop.eup %3457 }
 0x476   : > { %v2209_v52 = vpop.permute.xlu1 %2208 }
 0x477   : > { %v2306_v55 = vsel %vm379_vm2, %v800_v33, %v2209_v52 }
 0x47f   : > { %v2213_v57 = vpop.permute.xlu1 %2212 }
 0x480   : > { %v2308_v15 = vsel %vm379_vm2, %v802_v41, %v2213_v57 }
 0x483   : > { %v2215_v4 = vpop.permute.xlu1 %2214 }
 0x484   : > { %v2309_v35 = vsel %vm379_vm2, %v803_v47, %v2215_v4  ;;  %v807_v4 = vmul.f32 %v3458_v63, %v4553_v34  ;;  %v2670_v34 = vld [vmem:[%s4723_s3] ss:$0 sm:$0xff] }
 0x487   : > { %v2217_v39 = vpop.permute.xlu0 %2216 }
 0x488   : > { %v2310_v9 = vsel %vm379_vm2, %v804_v26, %v2217_v39 }
 0x48b   : > { %v4620_v58 = vpop.permute.xlu0 %2218 }
 0x48c   : > { %v2311_v22 = vsel %vm379_vm2, %v805_v6, %v4620_v58 }
 0x48f   : > { %v4623_v30 = vpop.permute.xlu0 %2220 }
 0x490   : > { %v2312_v27 = vsel %vm379_vm2, %v806_v59, %v4623_v30 }
 0x497   : > { %v2243_v10 = vpop.permute.xlu1 %2242 }
 0x498   : > { %v2315_v49 = vsel %vm2314_vm5, %v2305_v25, %v2243_v10 }
 0x49b   : > { %v2245_v18 = vpop.permute.xlu1 %2244 }
 0x49c   : > { %v2316_v11 = vsel %vm2314_vm5, %v2306_v55, %v2245_v18 }
 0x4a3   : > { %v2249_v56 = vpop.permute.xlu0 %2248 }
 0x4a4   : > { %v2318_v45 = vsel %vm2314_vm5, %v2308_v15, %v2249_v56 }
 0x4a7   : > { %v2251_v40 = vpop.permute.xlu0 %2250 }
 0x4a8   : > { %v2319_v51 = vsel %vm2314_vm5, %v2309_v35, %v2251_v40 }
 0x4ab   : > { %v2253_v0 = vpop.permute.xlu1 %2252 }
 0x4ac   : > { %v2320_v60 = vsel %vm2314_vm5, %v2310_v9, %v2253_v0 }
 0x4af   : > { %v2255_v24 = vpop.permute.xlu0 %2254 }
 0x4b0   : > { %v2321_v46 = vsel %vm2314_vm5, %v2311_v22, %v2255_v24 }
 0x4b3   : > { %v2257_v36 = vpop.permute.xlu0 %2256 }
 0x4b4   : > { %v2322_v52 = vsel %vm2314_vm5, %v2312_v27, %v2257_v36 }
 0x4b7   : > { %v2223_v31 = vpop.permute.xlu0 %2222 }
 0x4b8   : > { %v2313_v13 = vsel %vm379_vm2, %v807_v4, %v2223_v31 }
 0x4bb   : > { %v2279_v23 = vpop.permute.xlu1 %2278  ;;  %v2259_v38 = vpop.permute.xlu0 %2258 }
 0x4bc   : > { %v2325_v61 = vsel %vm2324_vm6, %v2315_v49, %v2279_v23  ;;  %v2323_v30 = vsel %vm2314_vm5, %v2313_v13, %v2259_v38 }
 0x4bd   : > { %3256 = vmatmul.mubr.msk.f32.vlgmr.msra.gmra.mxu0 %vm211_vm1, %v2325_v61 }
 0x4be   : > { %3258 = vmatprep.mubr.msk.f32.mxu0 %vm3468_vm0, %v4743_v62 }
 0x4c7   : > { %v2285_v3 = vpop.permute.xlu1 %2284 }
 0x4c8   : > { %v2328_v21 = vsel %vm2324_vm6, %v2318_v45, %v2285_v3 }
 0x4c9   : > { %3265 = vmatmul.mubr.msk.f32.vlgmr.msra.gmra.mxu1 %vm211_vm1, %v2328_v21 }
 0x4ca   : > { %3267 = vmatprep.mubr.msk.f32.mxu1 %vm3468_vm0, %v4743_v62 }
 0x4cb   : > { %v2287_v43 = vpop.permute.xlu1 %2286 }
 0x4cc   : > { %v2329_v29 = vsel %vm2324_vm6, %v2319_v51, %v2287_v43 }
 0x4cd   : > { %3268 = vmatmul.mubr.msk.f32.gmra.mxu1 %vm211_vm1, %v2329_v29 }
 0x4ce   : > { %3270 = vmatprep.mubr.msk.f32.mxu1 %vm3468_vm0, %v4743_v62 }
 0x4cf   : > { %v2281_v12 = vpop.permute.xlu1 %2280  ;;  %v2289_v44 = vpop.permute.xlu0 %2288 }
 0x4d0   : > { %v2326_v5 = vsel %vm2324_vm6, %v2316_v11, %v2281_v12  ;;  %v2330_v19 = vsel %vm2324_vm6, %v2320_v60, %v2289_v44 }
 0x4d1   : > { %3259 = vmatmul.mubr.msk.f32.gmra.mxu0 %vm211_vm1, %v2326_v5  ;;  %3271 = vmatmul.mubr.msk.f32.gmra.mxu1 %vm211_vm1, %v2330_v19 }
 0x4d2   : > { %3273 = vmatprep.mubr.msk.f32.mxu1 %vm3468_vm0, %v4743_v62  ;;  %3261 = vmatprep.mubr.msk.f32.mxu0 %vm3468_vm0, %v4743_v62 }
 0x4d3   : > { %v2211_v14 = vpop.permute.xlu1 %2210  ;;  %v2291_v20 = vpop.permute.xlu0 %2290 }
 0x4d4   : > { %v2331_v28 = vsel %vm2324_vm6, %v2321_v46, %v2291_v20  ;;  %v2307_v2 = vsel %vm379_vm2, %v801_v1, %v2211_v14 }
 0x4d5   : > { %3274 = vmatmul.mubr.msk.f32.gmra.mxu1 %vm211_vm1, %v2331_v28 }
 0x4d6   : > { %3276 = vmatprep.mubr.msk.f32.mxu1 %vm3468_vm0, %v4743_v62 }
 0x4d7   : > { %v2247_v54 = vpop.permute.xlu1 %2246 }
 0x4d8   : > { %v2317_v39 = vsel %vm2314_vm5, %v2307_v2, %v2247_v54 }
 0x4db   : > { %v2283_v57 = vpop.permute.xlu1 %2282  ;;  %v2293_v58 = vpop.permute.xlu0 %2292 }
 0x4dc   : > { %v2327_v10 = vsel %vm2324_vm6, %v2317_v39, %v2283_v57  ;;  %v2332_v16 = vsel %vm2324_vm6, %v2322_v52, %v2293_v58 }
 0x4dd   : > { %3262 = vmatmul.mubr.msk.f32.gmra.mxu0 %vm211_vm1, %v2327_v10  ;;  %3277 = vmatmul.mubr.msk.f32.gmra.mxu1 %vm211_vm1, %v2332_v16 }
 0x4de   : > { %3279 = vmatprep.mubr.msk.f32.mxu1 %vm3468_vm0, %v4743_v62 }
 0x4df   : > { %v2295_v56 = vpop.permute.xlu0 %2294 }
 0x4e0   : > { %v2333_v18 = vsel %vm2324_vm6, %v2323_v30, %v2295_v56 }
 0x4e1   : > { %3280 = vmatmul.mubr.msk.f32.gmra.mxu1 %vm211_vm1, %v2333_v18 }
 0x57d   : > { %v2438_v62 = vpop.f32.mrf.mxu0 }
 0x57e   : > { %v2439_v7 = vadd.f32 %v2670_v34, %v2438_v62 }
 0x57f   : > { %v3257_v40 = vpop.f32.mrf.mxu0 }
 0x580   : > { %2482 = vst.msk [vmem:[%s4697_s6] sm:$0xff] %vm211_vm1, %v2439_v7 }
 0x589   : > { %v2453_v0 = vpop.f32.mrf.mxu1 }
 0x58a   : > { %v2454_v42 = vadd.f32 %v2670_v34, %v2453_v0 }
 0x58b   : > { %v3266_v24 = vpop.f32.mrf.mxu1 }
 0x58c   : > { %2485 = vst.msk [vmem:[%s4697_s6 + $0x18] sm:$0xff] %vm211_vm1, %v2454_v42 }
 0x58d   : > { %v2458_v25 = vpop.f32.mrf.mxu1 }
 0x58e   : > { %v2459_v49 = vadd.f32 %v2670_v34, %v2458_v25 }
 0x58f   : > { %v3269_v23 = vpop.f32.mrf.mxu1 }
 0x590   : > { %2486 = vst.msk [vmem:[%s4697_s6 + $0x20] sm:$0xff] %vm211_vm1, %v2459_v49 }
 0x591   : > { %v2443_v61 = vpop.f32.mrf.mxu0  ;;  %v2463_v36 = vpop.f32.mrf.mxu1 }
 0x592   : > { %v2444_v37 = vadd.f32 %v2670_v34, %v2443_v61  ;;  %v2464_v41 = vadd.f32 %v2670_v34, %v2463_v36 }
 0x593   : > { %v3260_v17 = vpop.f32.mrf.mxu0  ;;  %v3272_v31 = vpop.f32.mrf.mxu1 }
 0x594   : > { %2483 = vst.msk [vmem:[%s4697_s6 + $0x8] sm:$0xff] %vm211_vm1, %v2444_v37  ;;  %2487 = vst.msk [vmem:[%s4697_s6 + $0x28] sm:$0xff] %vm211_vm1, %v2464_v41 }
 0x595   : > { %v2468_v15 = vpop.f32.mrf.mxu1 }
 0x596   : > { %v2469_v45 = vadd.f32 %v2670_v34, %v2468_v15 }
 0x597   : > { %v3275_v3 = vpop.f32.mrf.mxu1 }
 0x598   : > { %2488 = vst.msk [vmem:[%s4697_s6 + $0x30] sm:$0xff] %vm211_vm1, %v2469_v45 }
 0x59d   : > { %v2448_v8 = vpop.f32.mrf.mxu0  ;;  %v2473_v47 = vpop.f32.mrf.mxu1 }
 0x59e   : > { %v2449_v21 = vadd.f32 %v2670_v34, %v2448_v8  ;;  %v2474_v53 = vadd.f32 %v2670_v34, %v2473_v47 }
 0x59f   : > { %v3263_v35 = vpop.f32.mrf.mxu0  ;;  %v3278_v51 = vpop.f32.mrf.mxu1 }
 0x5a0   : > { %2484 = vst.msk [vmem:[%s4697_s6 + $0x10] sm:$0xff] %vm211_vm1, %v2449_v21  ;;  %2489 = vst.msk [vmem:[%s4697_s6 + $0x38] sm:$0xff] %vm211_vm1, %v2474_v53 }
 0x5a1   : > { %v2478_v38 = vpop.f32.mrf.mxu1 }
 0x5a2   : > { %v2479_v43 = vadd.f32 %v2670_v34, %v2478_v38 }
 0x5a3   : > { %v3281_v33 = vpop.f32.mrf.mxu1 }
 0x5a4   : > { %2490 = vst.msk [vmem:[%s4697_s6 + $0x40] sm:$0xff] %vm211_vm1, %v2479_v43 }
 0x5a5 PF: > { %s14_s15 = sadd.s32 1, %s3465_s15  }
 0x5a6   : > { %p11_p4 = scmp.ge.s32.totalorder %s14_s15, 4  }
 0x5a8   :  { %13 = sbr.rel (!%p11_p4) target bundleno = 1 (0x1), region = 66 }

</bundles_post_ra>
